<compile_context>
chip_gen: v7x
topology: tpu7x:2x2x1
jax: 0.10.0
libtpu: 0.0.40
codegen_flags: <defaults>
</compile_context>

<pallas_src>
import math

import jax
import jax.numpy as jnp
from jax.experimental import pallas as pl
from jax.experimental.pallas import tpu as pltpu

NEG_INF = -1e30  # pads the vocab-axis bias so padded logits never win


def _round_up(x, m):
    return (x + m - 1) // m * m


def _pad_to(x, shape, value=0.0):
    pads = [(0, t - s) for s, t in zip(x.shape, shape)]
    if all(p == (0, 0) for p in pads):
        return x
    return jnp.pad(x, pads, constant_values=value)


def _default_vmem_limit():
    """~3/4 of per-core VMEM: ~48 MiB on v7x (64 MiB), ~96 MiB on v5e/v6e (128 MiB)."""
    cap = 128 * 1024 * 1024
    try:
        cap = int(getattr(pltpu.get_tpu_info(), "vmem_capacity_bytes", cap))
    except Exception:
        pass
    return int(min(cap * 3 // 4, 100 * 1024 * 1024))


# --------------------------------------------------------------------------
# Kernel A: stacked single-step GRU + attention + att_combine (+ ReLU)
# --------------------------------------------------------------------------
def _make_gru_att_kernel(num_layers, h_pad, h_true):
    L = num_layers
    Hp = h_pad
    scale = 1.0 / math.sqrt(h_true)
    bf16 = jnp.bfloat16

    def kernel(embed_ref, h0_ref, enc_ref, *rest):
        if L > 1:
            (w_ih0_ref, w_ihr_ref, w_hh_ref, b_ih_ref, b_hh_ref,
             w_ca_ref, w_cb_ref, b_c_ref, dec_ref, hout_ref) = rest
        else:
            (w_ih0_ref, w_hh_ref, b_ih_ref, b_hh_ref,
             w_ca_ref, w_cb_ref, b_c_ref, dec_ref, hout_ref) = rest
            w_ihr_ref = None

        h0 = h0_ref[...]                                        # (L, Bp, Hp) f32

        # Hidden-side gate matmuls for all layers hoisted out of the serial
        # layer chain (they only depend on the initial hidden state): one
        # batched MXU matmul, bf16 weights, f32 accumulation.
        gh_all = jnp.einsum(
            "lbh,lhk->lbk", h0.astype(bf16), w_hh_ref[...],
            preferred_element_type=jnp.float32) + b_hh_ref[...]  # (L, Bp, 3Hp)

        # ---- serial stacked GRU (PyTorch gate order r, z, n), gates in f32 ----
        x = embed_ref[...]                                      # (Bp, Ep) f32
        for l in range(L):
            w_ih = w_ih0_ref[...] if l == 0 else w_ihr_ref[l - 1]
            gi = jnp.dot(x.astype(bf16), w_ih,
                         preferred_element_type=jnp.float32) + b_ih_ref[l]
            gh = gh_all[l]
            h = h0[l]
            # Hp is a multiple of 128, so these gate slices are lane-aligned.
            r = jax.nn.sigmoid(gi[:, 0 * Hp:1 * Hp] + gh[:, 0 * Hp:1 * Hp])
            z = jax.nn.sigmoid(gi[:, 1 * Hp:2 * Hp] + gh[:, 1 * Hp:2 * Hp])
            n = jnp.tanh(gi[:, 2 * Hp:3 * Hp] + r * gh[:, 2 * Hp:3 * Hp])
            h_new = (1.0 - z) * n + z * h
            hout_ref[l] = h_new
            x = h_new                                           # feeds next layer

        rnn_out = x                                             # (Bp, Hp) f32
        enc = enc_ref[...].astype(jnp.float32)                  # bf16 stream -> f32

        # ---- scaled dot-product attention on the VPU/XLU ----
        # (batched M=1 MXU matmuls are latency-bound; broadcast-mul + reductions
        #  use otherwise-idle slots inside this serial kernel)
        att = jnp.sum(rnn_out[:, None, :] * enc, axis=-1) * scale   # (Bp, S)
        att_max = jnp.max(att, axis=1, keepdims=True)
        p = jnp.exp(att - att_max)
        denom = jnp.sum(p, axis=1, keepdims=True)
        soft = p * pl.reciprocal(denom, approx=True)            # EUP slot, ~free
        ctx = jnp.sum(soft[:, :, None] * enc, axis=1)            # (Bp, Hp)

        # ---- att_combine + ReLU (split weights; no lane-dim concat) ----
        dec = (jnp.dot(rnn_out.astype(bf16), w_ca_ref[...],
                       preferred_element_type=jnp.float32)
               + jnp.dot(ctx.astype(bf16), w_cb_ref[...],
                         preferred_element_type=jnp.float32)
               + b_c_ref[...])
        dec_ref[...] = jnp.maximum(dec, 0.0)

    return kernel


# --------------------------------------------------------------------------
# Kernel B: vocab-tiled output projection + per-tile log-sum-exp stats
# --------------------------------------------------------------------------
def _proj_lse_kernel(dec_ref, w_ref, b_ref, logits_ref, m_ref, s_ref):
    logits = (jnp.dot(dec_ref[...].astype(jnp.bfloat16), w_ref[...],
                      preferred_element_type=jnp.float32) + b_ref[...])
    logits_ref[...] = logits
    m = jnp.max(logits, axis=-1, keepdims=True)                 # (Bp, 1)
    s = jnp.sum(jnp.exp(logits - m), axis=-1, keepdims=True)    # (Bp, 1)
    m_ref[...] = m[None, :, :]
    s_ref[...] = s[None, :, :]


# --------------------------------------------------------------------------
# Wrapper
# --------------------------------------------------------------------------
def att_mt_decoder_forward(inputs, init_hidden, encoder_outputs, params, *,
                           tile_v=2048):
    """inputs: (B, 1) int32; init_hidden: (L, B, H); encoder_outputs: (B, S, H)."""
    f32 = jnp.float32
    bf16 = jnp.bfloat16

    # Embedding lookup (gather) as JAX glue; dropout layers are eval-mode no-ops.
    tok = inputs[:, 0]
    embed = jnp.take(params["embedding"], tok, axis=0)          # (B, E)

    B, E = embed.shape
    L, _, H = init_hidden.shape
    S = encoder_outputs.shape[1]
    V = params["w_out"].shape[0]

    # Padded sizes: batch -> sublane multiple, feature dims -> lane multiple.
    Bp = _round_up(B, 8)
    Ep = _round_up(E, 128)
    Hp = _round_up(H, 128)

    tile_v = max(128, _round_up(min(tile_v, _round_up(V, 128)), 128))
    Vp = _round_up(V, tile_v)
    num_tiles = Vp // tile_v
    # Keep >= 2 vocab tiles when possible so the "parallel" axis can
    # megacore-shard across v7x's two TensorCores.
    if num_tiles < 2 and Vp >= 256:
        tile_v = _round_up(Vp // 2, 128)
        Vp = _round_up(V, tile_v)
        num_tiles = Vp // tile_v

    embed_p = _pad_to(embed.astype(f32), (Bp, Ep))
    h0_p = _pad_to(init_hidden.astype(f32), (L, Bp, Hp))
    enc_p = _pad_to(encoder_outputs.astype(bf16), (Bp, S, Hp))

    # ---- GRU weights: pre-transposed, per-gate zero-padded to Hp, bf16 ----
    w_ih_list, w_hh_list, b_ih_list, b_hh_list = [], [], [], []
    for l, g in enumerate(params["gru"]):
        in_dim = E if l == 0 else H
        in_pad = Ep if l == 0 else Hp
        w_ih = g["w_ih"].reshape(3, H, in_dim).transpose(0, 2, 1)     # (3, in, H)
        w_ih = _pad_to(w_ih.astype(f32), (3, in_pad, Hp))
        w_ih = w_ih.transpose(1, 0, 2).reshape(in_pad, 3 * Hp).astype(bf16)
        w_hh = g["w_hh"].reshape(3, H, H).transpose(0, 2, 1)
        w_hh = _pad_to(w_hh.astype(f32), (3, Hp, Hp))
        w_hh = w_hh.transpose(1, 0, 2).reshape(Hp, 3 * Hp).astype(bf16)
        b_ih = _pad_to(g["b_ih"].reshape(3, H).astype(f32), (3, Hp)).reshape(1, 3 * Hp)
        b_hh = _pad_to(g["b_hh"].reshape(3, H).astype(f32), (3, Hp)).reshape(1, 3 * Hp)
        w_ih_list.append(w_ih)
        w_hh_list.append(w_hh)
        b_ih_list.append(b_ih)
        b_hh_list.append(b_hh)
    w_ih0 = w_ih_list[0]                                        # (Ep, 3Hp) bf16
    w_hh_all = jnp.stack(w_hh_list, 0)                          # (L, Hp, 3Hp) bf16
    b_ih_all = jnp.stack(b_ih_list, 0)                          # (L, 1, 3Hp) f32
    b_hh_all = jnp.stack(b_hh_list, 0)                          # (L, 1, 3Hp) f32

    # ---- att_combine split into two (Hp, Hp) bf16 mats (no lane concat) ----
    w_ca = _pad_to(params["w_comb"][:, :H].T.astype(f32), (Hp, Hp)).astype(bf16)
    w_cb = _pad_to(params["w_comb"][:, H:].T.astype(f32), (Hp, Hp)).astype(bf16)
    b_c = _pad_to(params["b_comb"].reshape(1, H).astype(f32), (1, Hp))

    # ---- output projection: pre-transposed bf16 (Hp, Vp); f32 bias padded
    #      very negative so padded vocab columns never win (logits stay f32).
    w_out_t = _pad_to(params["w_out"].T.astype(f32), (Hp, Vp)).astype(bf16)
    b_out = _pad_to(params["b_out"].reshape(1, V).astype(f32), (1, Vp),
                    value=NEG_INF)
    # TODO(synk): further weight compression (int8 on v5e/v6e, fp8 on v7x) with
    # per-tile scales would halve the dominant w_out stream again.

    vmem = pl.BlockSpec(memory_space=pltpu.MemorySpace.VMEM)
    vmem_limit = _default_vmem_limit()

    # ---------------- call A: GRU + attention + combine ----------------
    gru_inputs = [embed_p, h0_p, enc_p, w_ih0]
    if L > 1:
        gru_inputs.append(jnp.stack(w_ih_list[1:], 0))          # (L-1, Hp, 3Hp)
    gru_inputs += [w_hh_all, b_ih_all, b_hh_all, w_ca, w_cb, b_c]
    # TODO(synk): for very large H*L the all-resident bf16 GRU weights could
    # still exceed v7x's 64 MiB VMEM; in that regime stream w_hh/w_ih per layer
    # with pltpu.emit_pipeline instead of whole-weight residency.
    dec, final_hidden_p = pl.pallas_call(
        _make_gru_att_kernel(L, Hp, H),
        out_shape=(jax.ShapeDtypeStruct((Bp, Hp), f32),
                   jax.ShapeDtypeStruct((L, Bp, Hp), f32)),
        in_specs=[vmem] * len(gru_inputs),
        out_specs=(vmem, vmem),
        compiler_params=pltpu.CompilerParams(vmem_limit_bytes=vmem_limit),
    )(*gru_inputs)

    # ------------- call B: vocab-tiled projection + tiled LSE -------------
    logits_p, tile_m, tile_s = pl.pallas_call(
        _proj_lse_kernel,
        grid=(num_tiles,),
        out_shape=(jax.ShapeDtypeStruct((Bp, Vp), f32),
                   jax.ShapeDtypeStruct((num_tiles, Bp, 1), f32),
                   jax.ShapeDtypeStruct((num_tiles, Bp, 1), f32)),
        in_specs=[
            pl.BlockSpec((Bp, Hp), lambda j: (0, 0)),
            pl.BlockSpec((Hp, tile_v), lambda j: (0, j)),   # default double-buffer
            pl.BlockSpec((1, tile_v), lambda j: (0, j)),
        ],
        out_specs=(
            pl.BlockSpec((Bp, tile_v), lambda j: (0, j)),
            pl.BlockSpec((1, Bp, 1), lambda j: (j, 0, 0)),
            pl.BlockSpec((1, Bp, 1), lambda j: (j, 0, 0)),
        ),
        compiler_params=pltpu.CompilerParams(
            dimension_semantics=("parallel",),     # megacore-shards on v7x
            vmem_limit_bytes=vmem_limit),
    )(dec, w_out_t, b_out)

    # Exact cross-tile LSE combine + final normalization in XLA glue
    # (O(B*V) bytes, negligible next to the (V,H) weight stream).
    m_glob = jnp.max(tile_m, axis=0)                                  # (Bp, 1)
    lse = m_glob + jnp.log(jnp.sum(tile_s * jnp.exp(tile_m - m_glob), axis=0))
    logp = (logits_p - lse)[:B, :V]
    final_hidden = final_hidden_p[:, :B, :H]
    return logp, final_hidden


# --------------------------------------------------------------------------
# Parameter init (mirrors the PyTorch module's init) and a pure-JAX reference
# --------------------------------------------------------------------------
def _init_params(key, vocab, embed_dim, hidden, num_layers):
    ks = iter(jax.random.split(key, 6 + 4 * num_layers))

    def uniform(k, shape, bound):
        return jax.random.uniform(k, shape, jnp.float32, -bound, bound)

    xav = math.sqrt(6.0 / (vocab + embed_dim))
    embedding = uniform(next(ks), (vocab, embed_dim), xav).at[0].set(0.0)

    gru = []
    bound = 1.0 / math.sqrt(hidden)
    for l in range(num_layers):
        in_dim = embed_dim if l == 0 else hidden
        gru.append(dict(
            w_ih=uniform(next(ks), (3 * hidden, in_dim), bound),
            w_hh=uniform(next(ks), (3 * hidden, hidden), bound),
            b_ih=uniform(next(ks), (3 * hidden,), bound),
            b_hh=uniform(next(ks), (3 * hidden,), bound),
        ))

    comb_bound = 1.0 / math.sqrt(2 * hidden)
    out_bound = 1.0 / math.sqrt(hidden)
    return dict(
        embedding=embedding,
        gru=gru,
        w_comb=uniform(next(ks), (hidden, 2 * hidden), comb_bound),
        b_comb=uniform(next(ks), (hidden,), comb_bound),
        w_out=uniform(next(ks), (vocab, hidden), out_bound),
        b_out=uniform(next(ks), (vocab,), out_bound),
    )


def _reference_forward(inputs, init_hidden, encoder_outputs, params):
    """Pure-JAX f32 mirror of the PyTorch forward (eval mode) for validation."""
    H = init_hidden.shape[-1]
    x = jnp.take(params["embedding"], inputs[:, 0], axis=0)
    finals = []
    for l, g in enumerate(params["gru"]):
        h = init_hidden[l]
        gi = x @ g["w_ih"].T + g["b_ih"]
        gh = h @ g["w_hh"].T + g["b_hh"]
        r = jax.nn.sigmoid(gi[:, :H] + gh[:, :H])
        z = jax.nn.sigmoid(gi[:, H:2 * H] + gh[:, H:2 * H])
        n = jnp.tanh(gi[:, 2 * H:] + r * gh[:, 2 * H:])
        h = (1 - z) * n + z * h
        finals.append(h)
        x = h
    rnn_out = x
    att = jnp.einsum("bh,bsh->bs", rnn_out, encoder_outputs) / math.sqrt(H)
    soft = jax.nn.softmax(att, axis=1)
    ctx = jnp.einsum("bs,bsh->bh", soft, encoder_outputs)
    dec = jax.nn.relu(jnp.concatenate([rnn_out, ctx], 1) @ params["w_comb"].T
                      + params["b_comb"])
    out = dec @ params["w_out"].T + params["b_out"]
    return jax.nn.log_softmax(out, -1), jnp.stack(finals, 0)


if __name__ == "__main__":
    # Small shapes consistent with the module; V chosen so the vocab grid has
    # multiple tiles (exercises the tiled log-sum-exp combine).
    B, S, H, E, V, L = 2, 8, 32, 16, 384, 2

    key = jax.random.PRNGKey(0)
    k_p, k_tok, k_h, k_enc = jax.random.split(key, 4)

    params = _init_params(k_p, V, E, H, L)
    inputs = jax.random.randint(k_tok, (B, 1), 1, V, dtype=jnp.int32)   # (bz, 1)
    init_hidden = jax.random.normal(k_h, (L, B, H), jnp.float32)        # (L, bz, H)
    encoder_outputs = jax.random.normal(k_enc, (B, S, H), jnp.float32)  # (bz, S, H)

    logp, final_hidden = att_mt_decoder_forward(
        inputs, init_hidden, encoder_outputs, params, tile_v=128)
    jax.block_until_ready((logp, final_hidden))

    ref_logp, ref_final = _reference_forward(inputs, init_hidden,
                                             encoder_outputs, params)
    assert logp.shape == (B, V) and final_hidden.shape == (L, B, H)
    # bf16 weight streams + approx softmax reciprocal -> looser tolerance than
    # a pure-f32 comparison.
    assert jnp.allclose(logp, ref_logp, atol=2e-2, rtol=2e-2), \
        float(jnp.max(jnp.abs(logp - ref_logp)))
    assert jnp.allclose(final_hidden, ref_final, atol=2e-2, rtol=2e-2), \
        float(jnp.max(jnp.abs(final_hidden - ref_final)))

    print("KERNEL_OK")
</pallas_src>

<mosaic_0001>
module attributes {stable_mosaic.version = 11 : i64} {
  func.func @kernel(%arg0: memref<8x128xf32, #tpu.memory_space<vmem>>, %arg1: memref<2x8x128xf32, #tpu.memory_space<vmem>>, %arg2: memref<8x8x128xbf16, #tpu.memory_space<vmem>>, %arg3: memref<128x384xbf16, #tpu.memory_space<vmem>>, %arg4: memref<1x128x384xbf16, #tpu.memory_space<vmem>>, %arg5: memref<2x128x384xbf16, #tpu.memory_space<vmem>>, %arg6: memref<2x1x384xf32, #tpu.memory_space<vmem>>, %arg7: memref<2x1x384xf32, #tpu.memory_space<vmem>>, %arg8: memref<128x128xbf16, #tpu.memory_space<vmem>>, %arg9: memref<128x128xbf16, #tpu.memory_space<vmem>>, %arg10: memref<1x128xf32, #tpu.memory_space<vmem>>, %arg11: memref<8x128xf32, #tpu.memory_space<vmem>>, %arg12: memref<2x8x128xf32, #tpu.memory_space<vmem>>) attributes {dimension_semantics = [], scalar_prefetch = 0 : i64, scratch_operands = 0 : i64, tpu.core_type = #tpu.core_type<tc>} {
    %c0 = arith.constant 0 : index
    %c0_0 = arith.constant 0 : index
    %c0_1 = arith.constant 0 : index
    %0 = vector.load %arg1[%c0, %c0_0, %c0_1] : memref<2x8x128xf32, #tpu.memory_space<vmem>>, vector<2x8x128xf32>
    %1 = arith.truncf %0 : vector<2x8x128xf32> to vector<2x8x128xbf16>
    %c0_2 = arith.constant 0 : index
    %c0_3 = arith.constant 0 : index
    %c0_4 = arith.constant 0 : index
    %2 = vector.load %arg5[%c0_2, %c0_3, %c0_4] : memref<2x128x384xbf16, #tpu.memory_space<vmem>>, vector<2x128x384xbf16>
    "tpu.trace_start"() <{level = 10 : i32, message = "lbh,lhk->lbk"}> : () -> ()
    %cst = arith.constant dense<0.000000e+00> : vector<2x8x384xf32>
    %3 = tpu.matmul %1, %2, %cst {dimension_numbers = #tpu.dot_dimension_numbers<[2], [1], [1], [2], [0, 0, 0, 1, 1, 2], [0], [0]>} : vector<2x8x128xbf16>, vector<2x128x384xbf16>, vector<2x8x384xf32> -> vector<2x8x384xf32>
    "tpu.trace_stop"() : () -> ()
    %c0_5 = arith.constant 0 : index
    %c0_6 = arith.constant 0 : index
    %c0_7 = arith.constant 0 : index
    %4 = vector.load %arg7[%c0_5, %c0_6, %c0_7] : memref<2x1x384xf32, #tpu.memory_space<vmem>>, vector<2x1x384xf32>
    %5 = vector.broadcast %4 : vector<2x1x384xf32> to vector<2x8x384xf32>
    %6 = arith.addf %3, %5 : vector<2x8x384xf32>
    %c0_8 = arith.constant 0 : index
    %c0_9 = arith.constant 0 : index
    %7 = vector.load %arg0[%c0_8, %c0_9] : memref<8x128xf32, #tpu.memory_space<vmem>>, vector<8x128xf32>
    %c0_10 = arith.constant 0 : index
    %c0_11 = arith.constant 0 : index
    %8 = vector.load %arg3[%c0_10, %c0_11] : memref<128x384xbf16, #tpu.memory_space<vmem>>, vector<128x384xbf16>
    %9 = arith.truncf %7 : vector<8x128xf32> to vector<8x128xbf16>
    %cst_12 = arith.constant dense<0.000000e+00> : vector<8x384xf32>
    %10 = tpu.matmul %9, %8, %cst_12 {dimension_numbers = #tpu.dot_dimension_numbers<[1], [0], [0], [1], [0, 0, 1, 1], [], []>} : vector<8x128xbf16>, vector<128x384xbf16>, vector<8x384xf32> -> vector<8x384xf32>
    %c0_13 = arith.constant 0 : index
    %c0_14 = arith.constant 0 : index
    %c0_15 = arith.constant 0 : index
    %11 = vector.load %arg6[%c0_13, %c0_14, %c0_15] : memref<2x1x384xf32, #tpu.memory_space<vmem>>, vector<1x1x384xf32>
    %12 = vector.shape_cast %11 : vector<1x1x384xf32> to vector<1x384xf32>
    %13 = vector.broadcast %12 : vector<1x384xf32> to vector<8x384xf32>
    %14 = arith.addf %10, %13 : vector<8x384xf32>
    %15 = vector.extract_strided_slice %6 {offsets = [0, 0, 0], sizes = [1, 8, 384], strides = [1, 1, 1]} : vector<2x8x384xf32> to vector<1x8x384xf32>
    %16 = vector.shape_cast %15 : vector<1x8x384xf32> to vector<8x384xf32>
    %17 = vector.extract_strided_slice %0 {offsets = [0, 0, 0], sizes = [1, 8, 128], strides = [1, 1, 1]} : vector<2x8x128xf32> to vector<1x8x128xf32>
    %18 = vector.shape_cast %17 : vector<1x8x128xf32> to vector<8x128xf32>
    %19 = vector.extract_strided_slice %14 {offsets = [0, 0], sizes = [8, 128], strides = [1, 1]} : vector<8x384xf32> to vector<8x128xf32>
    %20 = vector.extract_strided_slice %16 {offsets = [0, 0], sizes = [8, 128], strides = [1, 1]} : vector<8x384xf32> to vector<8x128xf32>
    %21 = arith.addf %19, %20 : vector<8x128xf32>
    %22 = arith.negf %21 : vector<8x128xf32>
    %23 = math.exp %22 : vector<8x128xf32>
    %cst_16 = arith.constant 1.000000e+00 : f32
    %24 = vector.broadcast %cst_16 : f32 to vector<8x128xf32>
    %25 = arith.addf %24, %23 : vector<8x128xf32>
    %26 = arith.divf %24, %25 : vector<8x128xf32>
    %27 = vector.extract_strided_slice %14 {offsets = [0, 128], sizes = [8, 128], strides = [1, 1]} : vector<8x384xf32> to vector<8x128xf32>
    %28 = vector.extract_strided_slice %16 {offsets = [0, 128], sizes = [8, 128], strides = [1, 1]} : vector<8x384xf32> to vector<8x128xf32>
    %29 = arith.addf %27, %28 : vector<8x128xf32>
    %30 = arith.negf %29 : vector<8x128xf32>
    %31 = math.exp %30 : vector<8x128xf32>
    %cst_17 = arith.constant 1.000000e+00 : f32
    %32 = vector.broadcast %cst_17 : f32 to vector<8x128xf32>
    %33 = arith.addf %32, %31 : vector<8x128xf32>
    %34 = arith.divf %32, %33 : vector<8x128xf32>
    %35 = vector.extract_strided_slice %14 {offsets = [0, 256], sizes = [8, 128], strides = [1, 1]} : vector<8x384xf32> to vector<8x128xf32>
    %36 = vector.extract_strided_slice %16 {offsets = [0, 256], sizes = [8, 128], strides = [1, 1]} : vector<8x384xf32> to vector<8x128xf32>
    %37 = arith.mulf %26, %36 : vector<8x128xf32>
    %38 = arith.addf %35, %37 : vector<8x128xf32>
    %39 = math.tanh %38 : vector<8x128xf32>
    %cst_18 = arith.constant 1.000000e+00 : f32
    %40 = vector.broadcast %cst_18 : f32 to vector<8x128xf32>
    %41 = arith.subf %40, %34 : vector<8x128xf32>
    %42 = arith.mulf %41, %39 : vector<8x128xf32>
    %43 = arith.mulf %34, %18 : vector<8x128xf32>
    %44 = arith.addf %42, %43 : vector<8x128xf32>
    %c0_19 = arith.constant 0 : index
    %c0_20 = arith.constant 0 : index
    %c0_21 = arith.constant 0 : index
    %45 = vector.load %arg12[%c0_19, %c0_20, %c0_21] : memref<2x8x128xf32, #tpu.memory_space<vmem>>, vector<1x8x128xf32>
    %46 = vector.shape_cast %45 : vector<1x8x128xf32> to vector<8x128xf32>
    %47 = vector.shape_cast %44 : vector<8x128xf32> to vector<1x8x128xf32>
    tpu.vector_store %arg12[%c0_19, %c0_20, %c0_21], %47 {strides = array<i32>} : memref<2x8x128xf32, #tpu.memory_space<vmem>>, vector<1x8x128xf32>,
    %c0_22 = arith.constant 0 : index
    %c0_23 = arith.constant 0 : index
    %c0_24 = arith.constant 0 : index
    %48 = vector.load %arg4[%c0_22, %c0_23, %c0_24] : memref<1x128x384xbf16, #tpu.memory_space<vmem>>, vector<1x128x384xbf16>
    %49 = vector.shape_cast %48 : vector<1x128x384xbf16> to vector<128x384xbf16>
    %50 = arith.truncf %44 : vector<8x128xf32> to vector<8x128xbf16>
    %cst_25 = arith.constant dense<0.000000e+00> : vector<8x384xf32>
    %51 = tpu.matmul %50, %49, %cst_25 {dimension_numbers = #tpu.dot_dimension_numbers<[1], [0], [0], [1], [0, 0, 1, 1], [], []>} : vector<8x128xbf16>, vector<128x384xbf16>, vector<8x384xf32> -> vector<8x384xf32>
    %c1 = arith.constant 1 : index
    %c0_26 = arith.constant 0 : index
    %c0_27 = arith.constant 0 : index
    %52 = vector.load %arg6[%c1, %c0_26, %c0_27] : memref<2x1x384xf32, #tpu.memory_space<vmem>>, vector<1x1x384xf32>
    %53 = vector.shape_cast %52 : vector<1x1x384xf32> to vector<1x384xf32>
    %54 = vector.broadcast %53 : vector<1x384xf32> to vector<8x384xf32>
    %55 = arith.addf %51, %54 : vector<8x384xf32>
    %56 = vector.extract_strided_slice %6 {offsets = [1, 0, 0], sizes = [1, 8, 384], strides = [1, 1, 1]} : vector<2x8x384xf32> to vector<1x8x384xf32>
    %57 = vector.shape_cast %56 : vector<1x8x384xf32> to vector<8x384xf32>
    %58 = vector.extract_strided_slice %0 {offsets = [1, 0, 0], sizes = [1, 8, 128], strides = [1, 1, 1]} : vector<2x8x128xf32> to vector<1x8x128xf32>
    %59 = vector.shape_cast %58 : vector<1x8x128xf32> to vector<8x128xf32>
    %60 = vector.extract_strided_slice %55 {offsets = [0, 0], sizes = [8, 128], strides = [1, 1]} : vector<8x384xf32> to vector<8x128xf32>
    %61 = vector.extract_strided_slice %57 {offsets = [0, 0], sizes = [8, 128], strides = [1, 1]} : vector<8x384xf32> to vector<8x128xf32>
    %62 = arith.addf %60, %61 : vector<8x128xf32>
    %63 = arith.negf %62 : vector<8x128xf32>
    %64 = math.exp %63 : vector<8x128xf32>
    %cst_28 = arith.constant 1.000000e+00 : f32
    %65 = vector.broadcast %cst_28 : f32 to vector<8x128xf32>
    %66 = arith.addf %65, %64 : vector<8x128xf32>
    %67 = arith.divf %65, %66 : vector<8x128xf32>
    %68 = vector.extract_strided_slice %55 {offsets = [0, 128], sizes = [8, 128], strides = [1, 1]} : vector<8x384xf32> to vector<8x128xf32>
    %69 = vector.extract_strided_slice %57 {offsets = [0, 128], sizes = [8, 128], strides = [1, 1]} : vector<8x384xf32> to vector<8x128xf32>
    %70 = arith.addf %68, %69 : vector<8x128xf32>
    %71 = arith.negf %70 : vector<8x128xf32>
    %72 = math.exp %71 : vector<8x128xf32>
    %cst_29 = arith.constant 1.000000e+00 : f32
    %73 = vector.broadcast %cst_29 : f32 to vector<8x128xf32>
    %74 = arith.addf %73, %72 : vector<8x128xf32>
    %75 = arith.divf %73, %74 : vector<8x128xf32>
    %76 = vector.extract_strided_slice %55 {offsets = [0, 256], sizes = [8, 128], strides = [1, 1]} : vector<8x384xf32> to vector<8x128xf32>
    %77 = vector.extract_strided_slice %57 {offsets = [0, 256], sizes = [8, 128], strides = [1, 1]} : vector<8x384xf32> to vector<8x128xf32>
    %78 = arith.mulf %67, %77 : vector<8x128xf32>
    %79 = arith.addf %76, %78 : vector<8x128xf32>
    %80 = math.tanh %79 : vector<8x128xf32>
    %cst_30 = arith.constant 1.000000e+00 : f32
    %81 = vector.broadcast %cst_30 : f32 to vector<8x128xf32>
    %82 = arith.subf %81, %75 : vector<8x128xf32>
    %83 = arith.mulf %82, %80 : vector<8x128xf32>
    %84 = arith.mulf %75, %59 : vector<8x128xf32>
    %85 = arith.addf %83, %84 : vector<8x128xf32>
    %c1_31 = arith.constant 1 : index
    %c0_32 = arith.constant 0 : index
    %c0_33 = arith.constant 0 : index
    %86 = vector.load %arg12[%c1_31, %c0_32, %c0_33] : memref<2x8x128xf32, #tpu.memory_space<vmem>>, vector<1x8x128xf32>
    %87 = vector.shape_cast %86 : vector<1x8x128xf32> to vector<8x128xf32>
    %88 = vector.shape_cast %85 : vector<8x128xf32> to vector<1x8x128xf32>
    tpu.vector_store %arg12[%c1_31, %c0_32, %c0_33], %88 {strides = array<i32>} : memref<2x8x128xf32, #tpu.memory_space<vmem>>, vector<1x8x128xf32>,
    %c0_34 = arith.constant 0 : index
    %c0_35 = arith.constant 0 : index
    %c0_36 = arith.constant 0 : index
    %89 = vector.load %arg2[%c0_34, %c0_35, %c0_36] : memref<8x8x128xbf16, #tpu.memory_space<vmem>>, vector<8x8x128xbf16>
    %90 = arith.extf %89 : vector<8x8x128xbf16> to vector<8x8x128xf32>
    %91 = vector.shape_cast %85 : vector<8x128xf32> to vector<8x1x128xf32>
    %92 = vector.broadcast %91 : vector<8x1x128xf32> to vector<8x8x128xf32>
    %93 = arith.mulf %92, %90 : vector<8x8x128xf32>
    %cst_37 = arith.constant dense<0.000000e+00> : vector<8x8xf32>
    %94 = vector.multi_reduction <add>, %93, %cst_37 [2] : vector<8x8x128xf32> to vector<8x8xf32>
    %cst_38 = arith.constant 0.176776692 : f32
    %95 = vector.broadcast %cst_38 : f32 to vector<8x8xf32>
    %96 = arith.mulf %94, %95 : vector<8x8xf32>
    %cst_39 = arith.constant dense<0xFF800000> : vector<8xf32>
    %97 = vector.multi_reduction <maximumf>, %96, %cst_39 [1] : vector<8x8xf32> to vector<8xf32>
    %98 = vector.shape_cast %97 : vector<8xf32> to vector<8x1xf32>
    %99 = vector.broadcast %98 : vector<8x1xf32> to vector<8x8xf32>
    %100 = arith.subf %96, %99 : vector<8x8xf32>
    %101 = math.exp %100 : vector<8x8xf32>
    %cst_40 = arith.constant dense<0.000000e+00> : vector<8xf32>
    %102 = vector.multi_reduction <add>, %101, %cst_40 [1] : vector<8x8xf32> to vector<8xf32>
    %103 = vector.shape_cast %102 : vector<8xf32> to vector<8x1xf32>
    %104 = tpu.reciprocal %103 {approx = true} : vector<8x1xf32> -> vector<8x1xf32>
    %105 = vector.broadcast %104 : vector<8x1xf32> to vector<8x8xf32>
    %106 = arith.mulf %101, %105 : vector<8x8xf32>
    %107 = vector.shape_cast %106 : vector<8x8xf32> to vector<8x8x1xf32>
    %108 = vector.broadcast %107 : vector<8x8x1xf32> to vector<8x8x128xf32>
    %109 = arith.mulf %108, %90 : vector<8x8x128xf32>
    %cst_41 = arith.constant dense<0.000000e+00> : vector<8x128xf32>
    %110 = vector.multi_reduction <add>, %109, %cst_41 [1] : vector<8x8x128xf32> to vector<8x128xf32>
    %111 = arith.truncf %85 : vector<8x128xf32> to vector<8x128xbf16>
    %c0_42 = arith.constant 0 : index
    %c0_43 = arith.constant 0 : index
    %112 = vector.load %arg8[%c0_42, %c0_43] : memref<128x128xbf16, #tpu.memory_space<vmem>>, vector<128x128xbf16>
    %cst_44 = arith.constant dense<0.000000e+00> : vector<8x128xf32>
    %113 = tpu.matmul %111, %112, %cst_44 {dimension_numbers = #tpu.dot_dimension_numbers<[1], [0], [0], [1], [0, 0, 1, 1], [], []>} : vector<8x128xbf16>, vector<128x128xbf16>, vector<8x128xf32> -> vector<8x128xf32>
    %114 = arith.truncf %110 : vector<8x128xf32> to vector<8x128xbf16>
    %c0_45 = arith.constant 0 : index
    %c0_46 = arith.constant 0 : index
    %115 = vector.load %arg9[%c0_45, %c0_46] : memref<128x128xbf16, #tpu.memory_space<vmem>>, vector<128x128xbf16>
    %cst_47 = arith.constant dense<0.000000e+00> : vector<8x128xf32>
    %116 = tpu.matmul %114, %115, %cst_47 {dimension_numbers = #tpu.dot_dimension_numbers<[1], [0], [0], [1], [0, 0, 1, 1], [], []>} : vector<8x128xbf16>, vector<128x128xbf16>, vector<8x128xf32> -> vector<8x128xf32>
    %117 = arith.addf %113, %116 : vector<8x128xf32>
    %c0_48 = arith.constant 0 : index
    %c0_49 = arith.constant 0 : index
    %118 = vector.load %arg10[%c0_48, %c0_49] : memref<1x128xf32, #tpu.memory_space<vmem>>, vector<1x128xf32>
    %119 = vector.broadcast %118 : vector<1x128xf32> to vector<8x128xf32>
    %120 = arith.addf %117, %119 : vector<8x128xf32>
    %cst_50 = arith.constant 0.000000e+00 : f32
    %121 = vector.broadcast %cst_50 : f32 to vector<8x128xf32>
    %122 = arith.maximumf %120, %121 : vector<8x128xf32>
    %c0_51 = arith.constant 0 : index
    %c0_52 = arith.constant 0 : index
    %123 = vector.load %arg11[%c0_51, %c0_52] : memref<8x128xf32, #tpu.memory_space<vmem>>, vector<8x128xf32>
    tpu.vector_store %arg11[%c0_51, %c0_52], %122 {strides = array<i32>} : memref<8x128xf32, #tpu.memory_space<vmem>>, vector<8x128xf32>,
    return
  }
}

</mosaic_0001>

<bundles_post_ra>
// kernel: tpu_custom_call.1
= control target key start
LH: loop header
LB: loop body
LE: loop exit
PB: predicated region body
PF: predicated region fallthrough
CT: control target
= control target key end

     0   :  { %18 = vsyncpa [#allocation3], 0  ;;  %s3410_s0 = inlined_call_operand.hbm [shape: f32[8,128], index: 0, kind: input, shape index: {}]   ;;  %s3411_s1 = inlined_call_operand.hbm [shape: f32[2,8,128], index: 1, kind: input, shape index: {}]   ;;  %s3412_s2 = inlined_call_operand.hbm [shape: bf16[8,8,128], index: 2, kind: input, shape index: {}]   ;;  %s3413_s3 = inlined_call_operand.hbm [shape: bf16[128,384], index: 3, kind: input, shape index: {}]   ;;  %s3414_s4 = inlined_call_operand.hbm [shape: bf16[1,128,384], index: 4, kind: input, shape index: {}]   ;;  %s3415_s5 = inlined_call_operand.hbm [shape: bf16[2,128,384], index: 5, kind: input, shape index: {}]   ;;  %s3416_s6 = inlined_call_operand.hbm [shape: f32[2,1,384], index: 6, kind: input, shape index: {}]   ;;  %s3417_s7 = inlined_call_operand.hbm [shape: f32[2,1,384], index: 7, kind: input, shape index: {}]   ;;  %s3418_s8 = inlined_call_operand.hbm [shape: bf16[128,128], index: 8, kind: input, shape index: {}]   ;;  %s3419_s9 = inlined_call_operand.hbm [shape: bf16[128,128], index: 9, kind: input, shape index: {}]   ;;  %s3420_s10 = inlined_call_operand.hbm [shape: f32[1,128], index: 10, kind: input, shape index: {}]   ;;  %s3421_s11 = inlined_call_operand.hbm [shape: f32[8,128], index: 11, kind: output, shape index: {0}]   ;;  %s3422_s12 = inlined_call_operand.hbm [shape: f32[2,8,128], index: 12, kind: output, shape index: {1}]  }
   0x1   :  { %19 = vsyncpa [#allocation6], 0 }
   0x2   :  { %20 = vsyncpa [#allocation9], 0 }
   0x3   :  { %21 = vsyncpa [#allocation12], 0 }
   0x4   :  { %22 = vsyncpa [#allocation15], 0 }
   0x5   :  { %23 = vsyncpa [#allocation18], 0 }
   0x6   :  { %24 = vsyncpa [#allocation4], 0 }
   0x7   :  { %25 = vsyncpa [#allocation22], 0  ;;  %s2883_s21 = smov [#allocation5]   ;;  %s2581_s25 = scalar_lea.hbm %s3411_s1, 256 }
   0x8   :  { %s41_s22 = sshll.u32 %s2883_s21, 4  ;;  %p2582_p0 = scmp.ne.s32.totalorder %s3411_s1, %s2581_s25  ;;  %s42_s22 = int_to_ptr.vmem [resolvable:$true] %s41_s22 }
   0x9   :  { %p2585_p1 = scmp.lt.u32.totalorder %s2581_s25, %s3411_s1 }
   0xb   :  { %p2587_p2 = pnand %p2585_p1, %p2582_p0 }
   0xd   :  { %2590 = shalt.err (!%p2587_p2)
}
   0xe   :  { %s2591_s30 = scalar_lea.vmem %s42_s22, 256  ;;  %p2596_p4 = scmp.lt.s32.totalorder %s42_s22, %s42_s22 }
   0xf   :  { %p2592_p3 = scmp.ne.s32.totalorder %s42_s22, %s2591_s30  ;;  %p2597_p5 = scmp.lt.s32.totalorder %s2591_s30, %s2591_s30 }
  0x11   :  { %p2598_p6 = por %p2597_p5, %p2596_p4 }
  0x13   :  { %p2599_p7 = pnand %p2598_p6, %p2592_p3 }
  0x15   :  { %2602 = shalt.err (!%p2599_p7)
}
  0x16   :  { %s2884_s13 = smov 128   ;;  %s2885_s14 = smov 8  }
  0x17   :  { %47 = dma.hbm_to_vmem [thread:$0]  %s3411_s1, 256, %s42_s22, [#allocation6], %s2884_s13, %s2884_s13, %s2885_s14  }
  0x18   :  { %s2886_s17 = smov [#allocation8]   ;;  %s2603_s21 = scalar_lea.hbm %s3413_s3, 3072 }
  0x19   :  { %s65_s18 = sshll.u32 %s2886_s17, 4  ;;  %p2604_p8 = scmp.ne.s32.totalorder %s3413_s3, %s2603_s21  ;;  %s66_s18 = int_to_ptr.vmem [resolvable:$true] %s65_s18 }
  0x1a   :  { %p2607_p9 = scmp.lt.u32.totalorder %s2603_s21, %s3413_s3 }
  0x1c   :  { %p2609_p10 = pnand %p2607_p9, %p2604_p8 }
  0x1e   :  { %2612 = shalt.err (!%p2609_p10)
}
  0x1f   :  { %s2613_s27 = scalar_lea.vmem %s66_s18, 3072  ;;  %p2618_p12 = scmp.lt.s32.totalorder %s66_s18, %s66_s18 }
  0x20   :  { %p2614_p11 = scmp.ne.s32.totalorder %s66_s18, %s2613_s27  ;;  %p2619_p13 = scmp.lt.s32.totalorder %s2613_s27, %s2613_s27 }
  0x22   :  { %p2620_p0 = por %p2619_p13, %p2618_p12 }
  0x24   :  { %p2621_p1 = pnand %p2620_p0, %p2614_p11 }
  0x26   :  { %2624 = shalt.err (!%p2621_p1)
}
  0x27   :  { %s2887_s1 = smov 192   ;;  %s2888_s22 = smov 12  }
  0x28   :  { %71 = dma.hbm_to_vmem [thread:$0]  %s3413_s3, 3072, %s66_s18, [#allocation9], %s2887_s1, %s2887_s1, %s2888_s22  }
  0x29   :  { %s2889_s30 = smov [#allocation11]   ;;  %s2625_s19 = scalar_lea.hbm %s3415_s5, 6144 }
  0x2a   :  { %s89_s15 = sshll.u32 %s2889_s30, 4  ;;  %p2626_p2 = scmp.ne.s32.totalorder %s3415_s5, %s2625_s19  ;;  %s90_s15 = int_to_ptr.vmem [resolvable:$true] %s89_s15 }
  0x2b   :  { %p2629_p3 = scmp.lt.u32.totalorder %s2625_s19, %s3415_s5 }
  0x2d   :  { %p2631_p4 = pnand %p2629_p3, %p2626_p2 }
  0x2f   :  { %2634 = shalt.err (!%p2631_p4)
}
  0x30   :  { %s2635_s25 = scalar_lea.vmem %s90_s15, 6144  ;;  %p2640_p6 = scmp.lt.s32.totalorder %s90_s15, %s90_s15 }
  0x31   :  { %p2636_p5 = scmp.ne.s32.totalorder %s90_s15, %s2635_s25  ;;  %p2641_p7 = scmp.lt.s32.totalorder %s2635_s25, %s2635_s25 }
  0x33   :  { %p2642_p8 = por %p2641_p7, %p2640_p6 }
  0x35   :  { %p2643_p9 = pnand %p2642_p8, %p2636_p5 }
  0x37   :  { %2646 = shalt.err (!%p2643_p9)
}
  0x38   :  { %95 = dma.hbm_to_vmem [thread:$0]  %s3415_s5, 6144, %s90_s15, [#allocation12], %s2887_s1, %s2887_s1, %s2888_s22  }
  0x39   :  { %s2890_s26 = smov [#allocation14]   ;;  %s2647_s30 = scalar_lea.hbm %s3417_s7, 96 }
  0x3a   :  { %s113_s27 = sshll.u32 %s2890_s26, 4  ;;  %p2648_p10 = scmp.ne.s32.totalorder %s3417_s7, %s2647_s30  ;;  %s114_s27 = int_to_ptr.vmem [resolvable:$true] %s113_s27 }
  0x3b   :  { %p2651_p11 = scmp.lt.u32.totalorder %s2647_s30, %s3417_s7 }
  0x3d   :  { %p2653_p12 = pnand %p2651_p11, %p2648_p10 }
  0x3f   :  { %2656 = shalt.err (!%p2653_p12)
}
  0x40   :  { %s2657_s21 = scalar_lea.vmem %s114_s27, 96  ;;  %p2662_p0 = scmp.lt.s32.totalorder %s114_s27, %s114_s27 }
  0x41   :  { %p2658_p13 = scmp.ne.s32.totalorder %s114_s27, %s2657_s21  ;;  %p2663_p1 = scmp.lt.s32.totalorder %s2657_s21, %s2657_s21 }
  0x43   :  { %p2664_p2 = por %p2663_p1, %p2662_p0 }
  0x45   :  { %p2665_p3 = pnand %p2664_p2, %p2658_p13 }
  0x47   :  { %2668 = shalt.err (!%p2665_p3)
}
  0x48   :  { %s2891_s5 = smov 48   ;;  %s2892_s15 = smov 3  }
  0x49   :  { %119 = dma.hbm_to_vmem [thread:$0]  %s3417_s7, 96, %s114_s27, [#allocation15], %s2891_s5, %s2891_s5, %s2892_s15  }
  0x4a   :  { %s2893_s25 = smov [#allocation17]   ;;  %s2894_s18 = smov [#allocation2]  }
  0x4b   :  { %s137_s3 = sshll.u32 %s2893_s25, 4  ;;  %s32_s26 = sshll.u32 %s2894_s18, 4  ;;  %s138_s3 = int_to_ptr.vmem [resolvable:$true] %s137_s3  ;;  %s33_s26 = int_to_ptr.vmem [resolvable:$true] %s32_s26 }
  0x4c   :  { %s2669_s30 = scalar_lea.hbm %s3419_s9, 1024 }
  0x4d   :  { %p2670_p4 = scmp.ne.s32.totalorder %s3419_s9, %s2669_s30  ;;  %p2673_p5 = scmp.lt.u32.totalorder %s2669_s30, %s3419_s9 }
  0x4f   :  { %p2675_p6 = pnand %p2673_p5, %p2670_p4 }
  0x51   :  { %2678 = shalt.err (!%p2675_p6)
}
  0x52   :  { %s2679_s7 = scalar_lea.vmem %s138_s3, 1024  ;;  %p2684_p8 = scmp.lt.s32.totalorder %s138_s3, %s138_s3 }
  0x53   :  { %p2680_p7 = scmp.ne.s32.totalorder %s138_s3, %s2679_s7  ;;  %p2685_p9 = scmp.lt.s32.totalorder %s2679_s7, %s2679_s7 }
  0x55   :  { %p2686_p10 = por %p2685_p9, %p2684_p8 }
  0x57   :  { %p2687_p11 = pnand %p2686_p10, %p2680_p7 }
  0x59   :  { %2690 = shalt.err (!%p2687_p11)
}
  0x5a   :  { %s2895_s27 = smov 64   ;;  %s2896_s21 = smov 4  }
  0x5b   :  { %143 = dma.hbm_to_vmem [thread:$0]  %s3419_s9, 1024, %s138_s3, [#allocation18], %s2895_s27, %s2895_s27, %s2896_s21  }
  0x5c   :  { %s2691_s28 = scalar_lea.hbm %s3410_s0, 128 }
  0x5d   :  { %p2692_p12 = scmp.ne.s32.totalorder %s3410_s0, %s2691_s28  ;;  %p2695_p13 = scmp.lt.u32.totalorder %s2691_s28, %s3410_s0 }
  0x5f   :  { %p2697_p0 = pnand %p2695_p13, %p2692_p12 }
  0x61   :  { %2700 = shalt.err (!%p2697_p0)
}
  0x62   :  { %s2701_s19 = scalar_lea.vmem %s33_s26, 128  ;;  %p2706_p2 = scmp.lt.s32.totalorder %s33_s26, %s33_s26 }
  0x63   :  { %p2702_p1 = scmp.ne.s32.totalorder %s33_s26, %s2701_s19  ;;  %p2707_p3 = scmp.lt.s32.totalorder %s2701_s19, %s2701_s19 }
  0x65   :  { %p2708_p4 = por %p2707_p3, %p2706_p2 }
  0x67   :  { %p2709_p5 = pnand %p2708_p4, %p2702_p1 }
  0x69   :  { %2712 = shalt.err (!%p2709_p5)
}
  0x6a   :  { %35 = dma.hbm_to_vmem [thread:$0]  %s3410_s0, 128, %s33_s26, [#allocation3]  }
  0x6b   :  { %s2897_s20 = smov [#allocation7]   ;;  %s2898_s23 = smov [#allocation10]  }
  0x6c   :  { %s53_s7 = sshll.u32 %s2897_s20, 4  ;;  %s77_s24 = sshll.u32 %s2898_s23, 4  ;;  %s54_s7 = int_to_ptr.vmem [resolvable:$true] %s53_s7  ;;  %s3060_s24 = int_to_ptr.vmem [resolvable:$true] %s77_s24 }
  0x6d   :  { %s2713_s28 = scalar_lea.hbm %s3412_s2, 512 }
  0x6e   :  { %p2714_p6 = scmp.ne.s32.totalorder %s3412_s2, %s2713_s28  ;;  %p2717_p7 = scmp.lt.u32.totalorder %s2713_s28, %s3412_s2 }
  0x70   :  { %p2719_p8 = pnand %p2717_p7, %p2714_p6 }
  0x72   :  { %2722 = shalt.err (!%p2719_p8)
}
  0x73   :  { %s2723_s0 = scalar_lea.vmem %s54_s7, 512  ;;  %p2728_p10 = scmp.lt.s32.totalorder %s54_s7, %s54_s7 }
  0x74   :  { %p2724_p9 = scmp.ne.s32.totalorder %s54_s7, %s2723_s0  ;;  %p2729_p11 = scmp.lt.s32.totalorder %s2723_s0, %s2723_s0 }
  0x76   :  { %p2730_p12 = por %p2729_p11, %p2728_p10 }
  0x78   :  { %p2731_p13 = pnand %p2730_p12, %p2724_p9 }
  0x7a   :  { %2734 = shalt.err (!%p2731_p13)
}
  0x7b   :  { %59 = dma.hbm_to_vmem [thread:$0]  %s3412_s2, 512, %s54_s7, [#allocation6], %s2895_s27, %s2895_s27, %s2896_s21  }
  0x7c   :  { %s2735_s20 = scalar_lea.hbm %s3414_s4, 3072 }
  0x7d   :  { %p2736_p0 = scmp.ne.s32.totalorder %s3414_s4, %s2735_s20  ;;  %p2739_p1 = scmp.lt.u32.totalorder %s2735_s20, %s3414_s4 }
  0x7f   :  { %p2741_p2 = pnand %p2739_p1, %p2736_p0 }
  0x81   :  { %2744 = shalt.err (!%p2741_p2)
}
  0x82   :  { %s2745_s29 = scalar_lea.vmem %s3060_s24, 3072  ;;  %p2750_p4 = scmp.lt.s32.totalorder %s3060_s24, %s3060_s24 }
  0x83   :  { %p2746_p3 = scmp.ne.s32.totalorder %s3060_s24, %s2745_s29  ;;  %p2751_p5 = scmp.lt.s32.totalorder %s2745_s29, %s2745_s29 }
  0x85   :  { %p2752_p6 = por %p2751_p5, %p2750_p4 }
  0x87   :  { %p2753_p7 = pnand %p2752_p6, %p2746_p3 }
  0x89   :  { %2756 = shalt.err (!%p2753_p7)
}
  0x8a   :  { %83 = dma.hbm_to_vmem [thread:$0]  %s3414_s4, 3072, %s3060_s24, [#allocation9], %s2887_s1, %s2887_s1, %s2888_s22  }
  0x8b   :  { %s2899_s30 = smov [#allocation13]   ;;  %s2900_s17 = smov [#allocation16]  }
  0x8c   :  { %s101_s16 = sshll.u32 %s2899_s30, 4  ;;  %s125_s0 = sshll.u32 %s2900_s17, 4  ;;  %s102_s16 = int_to_ptr.vmem [resolvable:$true] %s101_s16  ;;  %s3097_s0 = int_to_ptr.vmem [resolvable:$true] %s125_s0 }
  0x8d   :  { %s2757_s9 = scalar_lea.hbm %s3416_s6, 96 }
  0x8e   :  { %p2758_p8 = scmp.ne.s32.totalorder %s3416_s6, %s2757_s9  ;;  %p2761_p9 = scmp.lt.u32.totalorder %s2757_s9, %s3416_s6 }
  0x90   :  { %p2763_p10 = pnand %p2761_p9, %p2758_p8 }
  0x92   :  { %2766 = shalt.err (!%p2763_p10)
}
  0x93   :  { %s2767_s4 = scalar_lea.vmem %s102_s16, 96  ;;  %p2772_p12 = scmp.lt.s32.totalorder %s102_s16, %s102_s16 }
  0x94   :  { %p2768_p11 = scmp.ne.s32.totalorder %s102_s16, %s2767_s4  ;;  %p2773_p13 = scmp.lt.s32.totalorder %s2767_s4, %s2767_s4 }
  0x96   :  { %p2774_p0 = por %p2773_p13, %p2772_p12 }
  0x98   :  { %p2775_p1 = pnand %p2774_p0, %p2768_p11 }
  0x9a   :  { %2778 = shalt.err (!%p2775_p1)
}
  0x9b   :  { %107 = dma.hbm_to_vmem [thread:$0]  %s3416_s6, 96, %s102_s16, [#allocation12], %s2891_s5, %s2891_s5, %s2892_s15  }
  0x9c   :  { %s2779_s28 = scalar_lea.hbm %s3418_s8, 1024 }
  0x9d   :  { %p2780_p2 = scmp.ne.s32.totalorder %s3418_s8, %s2779_s28  ;;  %p2783_p3 = scmp.lt.u32.totalorder %s2779_s28, %s3418_s8 }
  0x9f   :  { %p2785_p4 = pnand %p2783_p3, %p2780_p2 }
  0xa1   :  { %2788 = shalt.err (!%p2785_p4)
}
  0xa2   :  { %s2789_s17 = scalar_lea.vmem %s3097_s0, 1024  ;;  %p2794_p6 = scmp.lt.s32.totalorder %s3097_s0, %s3097_s0 }
  0xa3   :  { %p2790_p5 = scmp.ne.s32.totalorder %s3097_s0, %s2789_s17  ;;  %p2795_p7 = scmp.lt.s32.totalorder %s2789_s17, %s2789_s17 }
  0xa5   :  { %p2796_p8 = por %p2795_p7, %p2794_p6 }
  0xa7   :  { %p2797_p9 = pnand %p2796_p8, %p2790_p5 }
  0xa9   :  { %2800 = shalt.err (!%p2797_p9)
}
  0xaa   :  { %131 = dma.hbm_to_vmem [thread:$0]  %s3418_s8, 1024, %s3097_s0, [#allocation15], %s2895_s27, %s2895_s27, %s2896_s21  }
  0xab   :  { %s2901_s15 = smov [#allocation19]   ;;  %s2801_s9 = scalar_lea.hbm %s3420_s10, 16 }
  0xac   :  { %s150_s16 = sshll.u32 %s2901_s15, 4  ;;  %p2802_p10 = scmp.ne.s32.totalorder %s3420_s10, %s2801_s9  ;;  %s151_s16 = int_to_ptr.vmem [resolvable:$true] %s150_s16 }
  0xad   :  { %p2805_p11 = scmp.lt.u32.totalorder %s2801_s9, %s3420_s10 }
  0xaf   :  { %p2807_p12 = pnand %p2805_p11, %p2802_p10 }
  0xb1   :  { %2810 = shalt.err (!%p2807_p12)
}
  0xb2   :  { %s2811_s4 = scalar_lea.vmem %s151_s16, 16  ;;  %s2815_s8 = scalar_lea.vmem %s151_s16, 32 }
  0xb3   :  { %p2812_p13 = scmp.ne.s32.totalorder %s151_s16, %s2811_s4  ;;  %p2816_p0 = scmp.lt.s32.totalorder %s151_s16, %s151_s16 }
  0xb4   :  { %p2817_p1 = scmp.lt.s32.totalorder %s2815_s8, %s2811_s4 }
  0xb6   :  { %p2818_p2 = por %p2817_p1, %p2816_p0 }
  0xb8   :  { %p2819_p3 = pnand %p2818_p2, %p2812_p13 }
  0xba   :  { %2822 = shalt.err (!%p2819_p3)
}
  0xbb   :  { %153 = dma.hbm_to_vmem [thread:$0]  %s3420_s10, 16, %s151_s16, [#allocation18]  }
  0xbc   :  { %2867 = dma.done.wait [#allocation3], 128  }
  0xbd   :  { %2868 = vsyncadd [#allocation3], 4294967168 }
  0xbe   :  { %2869 = dma.done.wait [#allocation6], 768  }
  0xbf   :  { %2870 = vsyncadd [#allocation6], 4294966528 }
  0xc0   :  { %2871 = dma.done.wait [#allocation9], 6144  }
  0xc1   :  { %2872 = vsyncadd [#allocation9], 4294961152 }
  0xc2   :  { %2873 = dma.done.wait [#allocation12], 6240  }
  0xc3   :  { %2874 = vsyncadd [#allocation12], 4294961056 }
  0xc4   :  { %2875 = dma.done.wait [#allocation15], 1120  }
  0xc5   :  { %2876 = vsyncadd [#allocation15], 4294966176 }
  0xc6   :  { %2877 = dma.done.wait [#allocation18], 1040  }
  0xc7   :  { %2878 = vsyncadd [#allocation18], 4294966256  ;;  %v2902_v0 = vmov 0.0   ;;  %v2903_v1 = vmov 0   ;;  %vm2904_vm0 = vmmov 0   ;;  %v3156_v24 = vld [vmem:[#allocation5] sm:$0xff] }
  0xc8   :  { %2236 = vmatprep.subr.bf16.mxu1 %v2902_v0  ;;  %450 = vmatprep.mubr.bf16.mxu0 %v2903_v1  ;;  %v2399_v2 = vld [vmem:[#allocation11 + $0x4] ss:$12 sps:$4 sm:$0xff]   ;;  %v2401_v3 = vld [vmem:[#allocation11] ss:$12 sps:$4 sm:$0xff]   ;;  %v2402_v4 = vld [vmem:[#allocation11 + $0x1c] ss:$12 sps:$4 sm:$0xff]   ;;  %v190_v26 = vpack.c.bf16 %v3156_v24, %v3156_v24 }
  0xc9   :  { %2252 = vmatprep.mubr.msk.bf16.mxu1 %vm2904_vm0, %v2902_v0  ;;  %2398 = vset.pattern.permute.xlu0 %v2903_v1  ;;  %v2404_v5 = vld [vmem:[#allocation11 + $0x18] ss:$12 sps:$4 sm:$0xff]   ;;  %v2405_v6 = vld [vmem:[#allocation11 + $0x34] ss:$12 sps:$4 sm:$0xff]   ;;  %v2407_v7 = vld [vmem:[#allocation11 + $0x30] ss:$12 sps:$4 sm:$0xff]  }
  0xca   :  { %2397 = vset.pattern.permute.xlu1 %v2903_v1  ;;  %418 = vmatprep.subr.bf16.mxu0 %v2399_v2  ;;  %v2408_v8 = vld [vmem:[#allocation11 + $0x4c] ss:$12 sps:$4 sm:$0xff]   ;;  %v2420_v9 = vld [vmem:[#allocation11 + $0x8] ss:$12 sps:$4 sm:$0xff]   ;;  %v2411_v11 = vld [vmem:[#allocation11 + $0x64] ss:$12 sps:$4 sm:$0xff]  }
  0xcb   :  { %419 = vmatpush1.bf16.msra.mxu0 %v2401_v3  ;;  %v2410_v10 = vld [vmem:[#allocation11 + $0x48] ss:$12 sps:$4 sm:$0xff]   ;;  %2237 = vmatpush3.bf16.msra.mxu1 %v2420_v9  ;;  %v2424_v12 = vld [vmem:[#allocation11 + $0x20] ss:$12 sps:$4 sm:$0xff]   ;;  %v2428_v15 = vld [vmem:[#allocation11 + $0x38] ss:$12 sps:$4 sm:$0xff]  }
  0xcc   :  { %420 = vmatprep.subr.bf16.mxu0 %v2402_v4  ;;  %2238 = vmatprep.subr.bf16.mxu1 %v2902_v0  ;;  %v2413_v13 = vld [vmem:[#allocation11 + $0x60] ss:$12 sps:$4 sm:$0xff]   ;;  %v2414_v14 = vld [vmem:[#allocation11 + $0x7c] ss:$12 sps:$4 sm:$0xff]   ;;  %v2416_v16 = vld [vmem:[#allocation11 + $0x78] ss:$12 sps:$4 sm:$0xff]  }
  0xcd   :  { %v2417_v17 = vld [vmem:[#allocation11 + $0x94] ss:$12 sps:$4 sm:$0xff]   ;;  %v2432_v18 = vld [vmem:[#allocation11 + $0x50] ss:$12 sps:$4 sm:$0xff]   ;;  %v2421_v20 = vld [vmem:[#allocation11 + $0xac] ss:$12 sps:$4 sm:$0xff]  }
  0xce   :  { %v2419_v19 = vld [vmem:[#allocation11 + $0x90] ss:$12 sps:$4 sm:$0xff]   ;;  %v2436_v21 = vld [vmem:[#allocation11 + $0x68] ss:$12 sps:$4 sm:$0xff]   ;;  %v2440_v25 = vld [vmem:[#allocation11 + $0x80] ss:$12 sps:$4 sm:$0xff]  }
  0xcf   :  { %421 = vmatpush1.bf16.msra.mxu0 %v2404_v5  ;;  %2239 = vmatpush3.bf16.msra.mxu1 %v2424_v12  ;;  %v2423_v22 = vld [vmem:[#allocation11 + $0xa8] ss:$12 sps:$4 sm:$0xff]   ;;  %v2427_v23 = vld [vmem:[#allocation11 + $0xc4] ss:$12 sps:$4 sm:$0xff]   ;;  %v2425_v27 = vld [vmem:[#allocation11 + $0xc0] ss:$12 sps:$4 sm:$0xff]  }
  0xd0   :  { %422 = vmatprep.subr.bf16.mxu0 %v2405_v6  ;;  %2240 = vmatprep.subr.bf16.mxu1 %v2902_v0  ;;  %v2431_v28 = vld [vmem:[#allocation11 + $0xdc] ss:$12 sps:$4 sm:$0xff]   ;;  %v2444_v29 = vld [vmem:[#allocation11 + $0x98] ss:$12 sps:$4 sm:$0xff]   ;;  %v2435_v31 = vld [vmem:[#allocation11 + $0xf4] ss:$12 sps:$4 sm:$0xff]  }
  0xd1   :  { %v2429_v30 = vld [vmem:[#allocation11 + $0xd8] ss:$12 sps:$4 sm:$0xff]   ;;  %v2448_v32 = vld [vmem:[#allocation11 + $0xb0] ss:$12 sps:$4 sm:$0xff]   ;;  %v2452_v35 = vld [vmem:[#allocation11 + $0xc8] ss:$12 sps:$4 sm:$0xff]  }
  0xd2   :  { %v2433_v33 = vld [vmem:[#allocation11 + $0xf0] ss:$12 sps:$4 sm:$0xff]   ;;  %v2439_v34 = vld [vmem:[#allocation11 + $0x10c] ss:$12 sps:$4 sm:$0xff]   ;;  %v2437_v36 = vld [vmem:[#allocation11 + $0x108] ss:$12 sps:$4 sm:$0xff]  }
  0xd3   :  { %423 = vmatpush1.bf16.msra.mxu0 %v2407_v7  ;;  %2241 = vmatpush3.bf16.msra.mxu1 %v2428_v15  ;;  %v2443_v37 = vld [vmem:[#allocation11 + $0x124] ss:$12 sps:$4 sm:$0xff]   ;;  %v2456_v38 = vld [vmem:[#allocation11 + $0xe0] ss:$12 sps:$4 sm:$0xff]   ;;  %v2447_v40 = vld [vmem:[#allocation11 + $0x13c] ss:$12 sps:$4 sm:$0xff]  }
  0xd4   :  { %424 = vmatprep.subr.bf16.mxu0 %v2408_v8  ;;  %2242 = vmatprep.subr.bf16.mxu1 %v2902_v0  ;;  %v2441_v39 = vld [vmem:[#allocation11 + $0x120] ss:$12 sps:$4 sm:$0xff]   ;;  %v2460_v41 = vld [vmem:[#allocation11 + $0xf8] ss:$12 sps:$4 sm:$0xff]   ;;  %v2464_v44 = vld [vmem:[#allocation11 + $0x110] ss:$12 sps:$4 sm:$0xff]  }
  0xd5   :  { %v2445_v42 = vld [vmem:[#allocation11 + $0x138] ss:$12 sps:$4 sm:$0xff]   ;;  %v2451_v43 = vld [vmem:[#allocation11 + $0x154] ss:$12 sps:$4 sm:$0xff]   ;;  %v2449_v45 = vld [vmem:[#allocation11 + $0x150] ss:$12 sps:$4 sm:$0xff]  }
  0xd6   :  { %v2455_v46 = vld [vmem:[#allocation11 + $0x16c] ss:$12 sps:$4 sm:$0xff]   ;;  %v2468_v47 = vld [vmem:[#allocation11 + $0x128] ss:$12 sps:$4 sm:$0xff]   ;;  %v2459_v50 = vld [vmem:[#allocation8 + $0x4] ss:$12 sps:$4 sm:$0xff]  }
  0xd7   :  { %425 = vmatpush1.bf16.msra.mxu0 %v2410_v10  ;;  %2243 = vmatpush3.bf16.msra.mxu1 %v2432_v18  ;;  %v2453_v48 = vld [vmem:[#allocation11 + $0x168] ss:$12 sps:$4 sm:$0xff]   ;;  %v3170_v49 = vld [vmem:[#allocation5 + $0x8] sm:$0xff]  ;;  %v2472_v51 = vld [vmem:[#allocation11 + $0x140] ss:$12 sps:$4 sm:$0xff]   ;;  %vm1453_vm1 = vcmask 1041409  }
  0xd8   :  { %426 = vmatprep.subr.bf16.mxu0 %v2411_v11  ;;  %2244 = vmatprep.subr.bf16.mxu1 %v2902_v0  ;;  %v2457_v52 = vld [vmem:[#allocation8] ss:$12 sps:$4 sm:$0xff]   ;;  %v191_v53 = vpack.c.bf16 %v3170_v49, %v3170_v49  ;;  %v2463_v54 = vld [vmem:[#allocation8 + $0x1c] ss:$12 sps:$4 sm:$0xff]   ;;  %v2476_v55 = vld [vmem:[#allocation11 + $0x158] ss:$12 sps:$4 sm:$0xff]  }
  0xd9   :  { %v2461_v56 = vld [vmem:[#allocation8 + $0x18] ss:$12 sps:$4 sm:$0xff]   ;;  %v2467_v57 = vld [vmem:[#allocation8 + $0x34] ss:$12 sps:$4 sm:$0xff]   ;;  %v2480_v58 = vld [vmem:[#allocation11 + $0x170] ss:$12 sps:$4 sm:$0xff]  }
  0xda   :  { %v2465_v59 = vld [vmem:[#allocation8 + $0x30] ss:$12 sps:$4 sm:$0xff]   ;;  %v2471_v60 = vld [vmem:[#allocation8 + $0x4c] ss:$12 sps:$4 sm:$0xff]   ;;  %v2484_v61 = vld [vmem:[#allocation8 + $0x8] ss:$12 sps:$4 sm:$0xff]  }
  0xdb   :  { %427 = vmatpush1.bf16.msra.mxu0 %v2413_v13  ;;  %2245 = vmatpush3.bf16.msra.mxu1 %v2436_v21  ;;  %v2469_v62 = vld [vmem:[#allocation8 + $0x48] ss:$12 sps:$4 sm:$0xff]   ;;  %v2475_v63 = vld [vmem:[#allocation8 + $0x64] ss:$12 sps:$4 sm:$0xff]   ;;  %v2488_v2 = vld [vmem:[#allocation8 + $0x20] ss:$12 sps:$4 sm:$0xff]  }
  0xdc   :  { %428 = vmatprep.subr.bf16.mxu0 %v2414_v14  ;;  %2246 = vmatprep.subr.bf16.mxu1 %v2902_v0  ;;  %v2473_v3 = vld [vmem:[#allocation8 + $0x60] ss:$12 sps:$4 sm:$0xff]   ;;  %v2479_v4 = vld [vmem:[#allocation8 + $0x7c] ss:$12 sps:$4 sm:$0xff]   ;;  %v2489_v5 = vld [vmem:[#allocation8 + $0x38] ss:$12 sps:$4 sm:$0xff]  }
  0xdd   :  { %v2477_v6 = vld [vmem:[#allocation8 + $0x78] ss:$12 sps:$4 sm:$0xff]   ;;  %v2483_v7 = vld [vmem:[#allocation8 + $0x94] ss:$12 sps:$4 sm:$0xff]   ;;  %v2490_v8 = vld [vmem:[#allocation8 + $0x50] ss:$12 sps:$4 sm:$0xff]  }
  0xde   :  { %v2481_v9 = vld [vmem:[#allocation8 + $0x90] ss:$12 sps:$4 sm:$0xff]   ;;  %v2487_v10 = vld [vmem:[#allocation8 + $0xac] ss:$12 sps:$4 sm:$0xff]   ;;  %v2491_v11 = vld [vmem:[#allocation8 + $0x68] ss:$12 sps:$4 sm:$0xff]  }
  0xdf   :  { %429 = vmatpush1.bf16.msra.mxu0 %v2416_v16  ;;  %2247 = vmatpush3.bf16.msra.mxu1 %v2440_v25  ;;  %v2485_v12 = vld [vmem:[#allocation8 + $0xa8] ss:$12 sps:$4 sm:$0xff]   ;;  %v2492_v14 = vld [vmem:[#allocation8 + $0x80] ss:$12 sps:$4 sm:$0xff]   ;;  %v2493_v16 = vld [vmem:[#allocation8 + $0x98] ss:$12 sps:$4 sm:$0xff]  }
  0xe0   :  { %430 = vmatprep.subr.bf16.mxu0 %v2417_v17  ;;  %2248 = vmatprep.subr.bf16.mxu1 %v2902_v0  ;;  %v708_v13 = vld [vmem:[#allocation2] sm:$0xff]  ;;  %v2494_v17 = vld [vmem:[#allocation8 + $0xb0] ss:$12 sps:$4 sm:$0xff]   ;;  %v2499_v21 = vld [vmem:[#allocation10 + $0x18] ss:$12 sps:$4 sm:$0xff]   ;;  %vm1455_vm2 = vcmask 1042434  }
  0xe1   :  { %v741_v15 = vpack.c.bf16 %v708_v13, %v708_v13  ;;  %v2497_v18 = vld [vmem:[#allocation10 + $0x4] ss:$12 sps:$4 sm:$0xff]   ;;  %vm1457_vm3 = vcmask 1043459   ;;  %vm1459_vm4 = vcmask 1044484   ;;  %vm1461_vm5 = vcmask 1045509   ;;  %s2906_s10 = smov [#allocation21]  }
  0xe2   :  { %v2503_v25 = vld [vmem:[#allocation10 + $0x30] ss:$12 sps:$4 sm:$0xff]   ;;  %vm1463_vm6 = vcmask 1046534   ;;  %vm1465_vm7 = vcmask 1047559   ;;  %vm1468_vm8 = vcmask 64512   ;;  %s2025_s0 = sshll.u32 %s2906_s10, 4  ;;  %s2026_s0 = int_to_ptr.vmem [resolvable:$true] %s2025_s0 }
  0xe3   :  { %431 = vmatpush1.bf16.msra.mxu0 %v2419_v19  ;;  %2249 = vmatpush3.bf16.msra.mxu1 %v2444_v29  ;;  %v2495_v19 = vld [vmem:[#allocation10] ss:$12 sps:$4 sm:$0xff]   ;;  %v2510_v29 = vld [vmem:[#allocation10 + $0x50] ss:$12 sps:$4 sm:$0xff]   ;;  %s2823_s1 = scalar_lea.vmem %s2026_s0, 256  ;;  %p2828_p5 = scmp.lt.s32.totalorder %s2026_s0, %s2026_s0 }
  0xe4   :  { %432 = vmatprep.subr.bf16.mxu0 %v2421_v20  ;;  %2250 = vmatprep.subr.bf16.mxu1 %v2902_v0  ;;  %v2498_v20 = vld [vmem:[#allocation10 + $0x8] ss:$12 sps:$4 sm:$0xff]   ;;  %p2824_p4 = scmp.ne.s32.totalorder %s2026_s0, %s2823_s1  ;;  %p2829_p6 = scmp.lt.s32.totalorder %s2823_s1, %s2823_s1 }
  0xe6   :  { %p2830_p7 = por %p2829_p6, %p2828_p5 }
  0xe7   :  { %433 = vmatpush1.bf16.msra.mxu0 %v2423_v22  ;;  %2251 = vmatpush3.bf16.msra.mxu1 %v2448_v32  ;;  %v2501_v22 = vld [vmem:[#allocation10 + $0x1c] ss:$12 sps:$4 sm:$0xff]  }
  0xe8   :  { %627 = vmatprep.subr.bf16.mxu0 %v2427_v23  ;;  %2256 = vmatprep.subr.bf16.mxu1 %v2902_v0  ;;  %v2505_v23 = vld [vmem:[#allocation10 + $0x34] ss:$12 sps:$4 sm:$0xff]   ;;  %p2831_p8 = pnand %p2830_p7, %p2824_p4 }
  0xe9   :  { %v2514_v32 = vld [vmem:[#allocation10 + $0x68] ss:$12 sps:$4 sm:$0xff]  }
  0xea   :  { %451 = vmatmul.mubr.bf16.vlgmr.msra.gmra.mrb[0].mxu0 %v190_v26  ;;  %2253 = vmatmul.mubr.bf16.vlgmr.msra.gmra.mrb[0].mxu1 %v190_v26  ;;  %v2506_v26 = vld [vmem:[#allocation10 + $0x38] ss:$12 sps:$4 sm:$0xff]  }
  0xeb   :  { %628 = vmatpush1.bf16.msra.mxu0 %v2425_v27  ;;  %659 = vmatprep.mubr.bf16.mxu0 %v2903_v1  ;;  %v2509_v27 = vld [vmem:[#allocation10 + $0x4c] ss:$12 sps:$4 sm:$0xff]  }
  0xec   :  { %629 = vmatprep.subr.bf16.mxu0 %v2431_v28  ;;  %2257 = vmatpush3.bf16.msra.mxu1 %v2452_v35  ;;  %v2507_v28 = vld [vmem:[#allocation10 + $0x48] ss:$12 sps:$4 sm:$0xff]   ;;  %v2518_v35 = vld [vmem:[#allocation10 + $0x80] ss:$12 sps:$4 sm:$0xff]  }
  0xed   :  { %2258 = vmatprep.subr.bf16.mxu1 %v2902_v0  ;;  %2272 = vmatprep.mubr.msk.bf16.mxu1 %vm2904_vm0, %v2902_v0 }
  0xef   :  { %630 = vmatpush1.bf16.msra.mxu0 %v2429_v30  ;;  %v2513_v30 = vld [vmem:[#allocation10 + $0x64] ss:$12 sps:$4 sm:$0xff]  }
  0xf0   :  { %631 = vmatprep.subr.bf16.mxu0 %v2435_v31  ;;  %2259 = vmatpush3.bf16.msra.mxu1 %v2456_v38  ;;  %v2511_v31 = vld [vmem:[#allocation10 + $0x60] ss:$12 sps:$4 sm:$0xff]   ;;  %v2522_v38 = vld [vmem:[#allocation10 + $0x98] ss:$12 sps:$4 sm:$0xff]  }
  0xf1   :  { %2260 = vmatprep.subr.bf16.mxu1 %v2902_v0 }
  0xf3   :  { %632 = vmatpush1.bf16.msra.mxu0 %v2433_v33  ;;  %v2517_v33 = vld [vmem:[#allocation10 + $0x7c] ss:$12 sps:$4 sm:$0xff]  }
  0xf4   :  { %633 = vmatprep.subr.bf16.mxu0 %v2439_v34  ;;  %2261 = vmatpush3.bf16.msra.mxu1 %v2460_v41  ;;  %v2515_v34 = vld [vmem:[#allocation10 + $0x78] ss:$12 sps:$4 sm:$0xff]   ;;  %v2526_v41 = vld [vmem:[#allocation10 + $0xb0] ss:$12 sps:$4 sm:$0xff]  }
  0xf5   :  { %2262 = vmatprep.subr.bf16.mxu1 %v2902_v0 }
  0xf7   :  { %634 = vmatpush1.bf16.msra.mxu0 %v2437_v36  ;;  %v2521_v36 = vld [vmem:[#allocation10 + $0x94] ss:$12 sps:$4 sm:$0xff]  }
  0xf8   :  { %635 = vmatprep.subr.bf16.mxu0 %v2443_v37  ;;  %2263 = vmatpush3.bf16.msra.mxu1 %v2464_v44  ;;  %v2519_v37 = vld [vmem:[#allocation10 + $0x90] ss:$12 sps:$4 sm:$0xff]  }
  0xf9   :  { %2264 = vmatprep.subr.bf16.mxu1 %v2902_v0 }
  0xfb   :  { %636 = vmatpush1.bf16.msra.mxu0 %v2441_v39  ;;  %v2525_v39 = vld [vmem:[#allocation10 + $0xac] ss:$12 sps:$4 sm:$0xff]  }
  0xfc   :  { %637 = vmatprep.subr.bf16.mxu0 %v2447_v40  ;;  %2265 = vmatpush3.bf16.msra.mxu1 %v2468_v47  ;;  %v2523_v40 = vld [vmem:[#allocation10 + $0xa8] ss:$12 sps:$4 sm:$0xff]  }
  0xfd   :  { %2266 = vmatprep.subr.bf16.mxu1 %v2902_v0 }
  0xff   :  { %638 = vmatpush1.bf16.msra.mxu0 %v2445_v42 }
 0x100   :  { %639 = vmatprep.subr.bf16.mxu0 %v2451_v43  ;;  %2267 = vmatpush3.bf16.msra.mxu1 %v2472_v51  ;;  %v260_v51 = vlaneseq }
 0x101   :  { %2268 = vmatprep.subr.bf16.mxu1 %v2902_v0 }
 0x103   :  { %640 = vmatpush1.bf16.msra.mxu0 %v2449_v45 }
 0x104   :  { %641 = vmatprep.subr.bf16.mxu0 %v2455_v46  ;;  %2269 = vmatpush3.bf16.msra.mxu1 %v2476_v55  ;;  %v256_v55 = vld [vmem:[#allocation14] sm:$0x7] }
 0x105   :  { %2270 = vmatprep.subr.bf16.mxu1 %v2902_v0 }
 0x107   :  { %642 = vmatpush1.bf16.msra.mxu0 %v2453_v48 }
 0x108   :  { %887 = vmatprep.subr.bf16.mxu0 %v2459_v50  ;;  %2271 = vmatpush3.bf16.msra.mxu1 %v2480_v58 }
 0x109   :  { %2276 = vmatprep.subr.bf16.mxu1 %v2902_v0 }
 0x10a   :  { %660 = vmatmul.mubr.bf16.vlgmr.msra.gmra.mrb[4].mxu0 %v191_v53 }
 0x10b   :  { %888 = vmatpush1.bf16.msra.mxu0 %v2457_v52  ;;  %919 = vmatprep.mubr.bf16.mxu0 %v2903_v1  ;;  %v3205_v52 = vshrl.u32 %v260_v51, 7 }
 0x10c   :  { %889 = vmatprep.subr.bf16.mxu0 %v2463_v54  ;;  %2273 = vmatmul.mubr.bf16.vlgmr.msra.gmra.mrb[4].mxu1 %v191_v53  ;;  %v742_v54 = vld [vmem:[#allocation13] sm:$0x7] }
 0x10d   :  { %2277 = vmatpush3.bf16.msra.mxu1 %v2484_v61  ;;  %2292 = vmatprep.mubr.msk.bf16.mxu1 %vm2904_vm0, %v2902_v0  ;;  %v3208_v53 = vsub.s32 0, %v3205_v52 }
 0x10e   :  { %2278 = vmatprep.subr.bf16.mxu1 %v2902_v0 }
 0x10f   :  { %890 = vmatpush1.bf16.msra.mxu0 %v2461_v56  ;;  %v3211_v56 = vsub.s32 1, %v3205_v52  ;;  %v747_v58 = vrot.slane %v742_v54, %v3208_v53 }
 0x110   :  { %891 = vmatprep.subr.bf16.mxu0 %v2467_v57  ;;  %v263_v57 = vrot.slane %v256_v55, %v3208_v53 }
 0x111   :  { %2279 = vmatpush3.bf16.msra.mxu1 %v2488_v2 }
 0x112   :  { %2280 = vmatprep.subr.bf16.mxu1 %v2902_v0  ;;  %v2356_v61 = vadd.f32 %v747_v58, %v263_v57 }
 0x113   :  { %892 = vmatpush1.bf16.msra.mxu0 %v2465_v59  ;;  %v267_v59 = vrot.slane %v256_v55, %v3211_v56 }
 0x114   :  { %893 = vmatprep.subr.bf16.mxu0 %v2471_v60  ;;  %v751_v60 = vrot.slane %v742_v54, %v3211_v56 }
 0x115   :  { %2281 = vmatpush3.bf16.msra.mxu1 %v2489_v5 }
 0x116   :  { %2282 = vmatprep.subr.bf16.mxu1 %v2902_v0 }
 0x117   :  { %894 = vmatpush1.bf16.msra.mxu0 %v2469_v62 }
 0x118   :  { %895 = vmatprep.subr.bf16.mxu0 %v2475_v63  ;;  %v2358_v63 = vadd.f32 %v751_v60, %v267_v59 }
 0x119   :  { %2283 = vmatpush3.bf16.msra.mxu1 %v2490_v8 }
 0x11a   :  { %2284 = vmatprep.subr.bf16.mxu1 %v2902_v0 }
 0x11b   :  { %896 = vmatpush1.bf16.msra.mxu0 %v2473_v3 }
 0x11c   :  { %897 = vmatprep.subr.bf16.mxu0 %v2479_v4 }
 0x11d   :  { %2285 = vmatpush3.bf16.msra.mxu1 %v2491_v11 }
 0x11e   :  { %2286 = vmatprep.subr.bf16.mxu1 %v2902_v0 }
 0x11f   :  { %898 = vmatpush1.bf16.msra.mxu0 %v2477_v6 }
 0x120   :  { %899 = vmatprep.subr.bf16.mxu0 %v2483_v7 }
 0x121   :  { %2287 = vmatpush3.bf16.msra.mxu1 %v2492_v14 }
 0x122   :  { %2288 = vmatprep.subr.bf16.mxu1 %v2902_v0 }
 0x123   :  { %900 = vmatpush1.bf16.msra.mxu0 %v2481_v9 }
 0x124   :  { %901 = vmatprep.subr.bf16.mxu0 %v2487_v10 }
 0x125   :  { %2289 = vmatpush3.bf16.msra.mxu1 %v2493_v16 }
 0x126   :  { %2290 = vmatprep.subr.bf16.mxu1 %v2902_v0 }
 0x127   :  { %902 = vmatpush1.bf16.msra.mxu0 %v2485_v12 }
 0x128   :  { %1169 = vmatprep.subr.bf16.mxu0 %v2497_v18 }
 0x129   :  { %2291 = vmatpush3.bf16.msra.mxu1 %v2494_v17 }
 0x12a   :  { %920 = vmatmul.mubr.bf16.vlgmr.msra.gmra.mrb[0].mxu0 %v741_v15  ;;  %2296 = vmatprep.subr.bf16.mxu1 %v2902_v0 }
 0x12b   :  { %1201 = vmatprep.mubr.bf16.mxu0 %v2903_v1  ;;  %1170 = vmatpush1.bf16.msra.mxu0 %v2495_v19  ;;  %v2502_v1 = vld [vmem:[#allocation10 + $0x20] ss:$12 sps:$4 sm:$0xff]  }
 0x12c   :  { %2293 = vmatmul.mubr.bf16.vlgmr.msra.gmra.mrb[8].mxu1 %v741_v15  ;;  %1171 = vmatprep.subr.bf16.mxu0 %v2501_v22  ;;  %v3218_v15 = vsub.s32 2, %v3205_v52 }
 0x12d   :  { %2312 = vmatprep.mubr.msk.bf16.mxu1 %vm2904_vm0, %v2902_v0  ;;  %2297 = vmatpush3.bf16.msra.mxu1 %v2498_v20 }
 0x12e   :  { %2298 = vmatprep.subr.bf16.mxu1 %v2902_v0  ;;  %v271_v17 = vrot.slane %v256_v55, %v3218_v15  ;;  %v755_v18 = vrot.slane %v742_v54, %v3218_v15 }
 0x12f   :  { %1172 = vmatpush1.bf16.msra.mxu0 %v2499_v21 }
 0x130   :  { %1173 = vmatprep.subr.bf16.mxu0 %v2505_v23 }
 0x131   :  { %2299 = vmatpush3.bf16.msra.mxu1 %v2502_v1 }
 0x132   :  { %2300 = vmatprep.subr.bf16.mxu1 %v2902_v0 }
 0x133   :  { %1174 = vmatpush1.bf16.msra.mxu0 %v2503_v25 }
 0x134   :  { %1175 = vmatprep.subr.bf16.mxu0 %v2509_v27 }
 0x135   :  { %2301 = vmatpush3.bf16.msra.mxu1 %v2506_v26 }
 0x136   :  { %2302 = vmatprep.subr.bf16.mxu1 %v2902_v0 }
 0x137   :  { %1176 = vmatpush1.bf16.msra.mxu0 %v2507_v28 }
 0x138   :  { %1177 = vmatprep.subr.bf16.mxu0 %v2513_v30 }
 0x139   :  { %2303 = vmatpush3.bf16.msra.mxu1 %v2510_v29 }
 0x13a   :  { %2304 = vmatprep.subr.bf16.mxu1 %v2902_v0 }
 0x13b   :  { %1178 = vmatpush1.bf16.msra.mxu0 %v2511_v31 }
 0x13c   :  { %1179 = vmatprep.subr.bf16.mxu0 %v2517_v33  ;;  %v2528_v33 = vld [vmem:[#allocation16 + $0x8] sm:$0xff]  }
 0x13d   :  { %2305 = vmatpush3.bf16.msra.mxu1 %v2514_v32  ;;  %v2527_v32 = vld [vmem:[#allocation16] sm:$0xff]  }
 0x13e   :  { %2306 = vmatprep.subr.bf16.mxu1 %v2902_v0 }
 0x13f   :  { %1180 = vmatpush1.bf16.msra.mxu0 %v2515_v34  ;;  %v2530_v34 = vld [vmem:[#allocation16 + $0x18] sm:$0xff]  }
 0x140   :  { %1181 = vmatprep.subr.bf16.mxu0 %v2521_v36  ;;  %v2532_v36 = vld [vmem:[#allocation16 + $0x28] sm:$0xff]  }
 0x141   :  { %2307 = vmatpush3.bf16.msra.mxu1 %v2518_v35  ;;  %v2531_v35 = vld [vmem:[#allocation16 + $0x20] sm:$0xff]  }
 0x142   :  { %2308 = vmatprep.subr.bf16.mxu1 %v2902_v0 }
 0x143   :  { %1182 = vmatpush1.bf16.msra.mxu0 %v2519_v37  ;;  %v2533_v37 = vld [vmem:[#allocation16 + $0x30] sm:$0xff]  }
 0x144   :  { %1183 = vmatprep.subr.bf16.mxu0 %v2525_v39  ;;  %v1024_v39 = vld [vmem:[#allocation13 + $0x3] sm:$0x7] }
 0x145   :  { %2309 = vmatpush3.bf16.msra.mxu1 %v2522_v38  ;;  %v2534_v38 = vld [vmem:[#allocation16 + $0x38] sm:$0xff]  }
 0x146   :  { %2310 = vmatprep.subr.bf16.mxu1 %v2902_v0 }
 0x147   :  { %1184 = vmatpush1.bf16.msra.mxu0 %v2523_v40  ;;  %v257_v40 = vld [vmem:[#allocation14 + $0x3] sm:$0x7] }
 0x148   :  { %2316 = vmatprep.subr.bf16.mxu0 %v2902_v0 }
 0x149   :  { %2311 = vmatpush3.bf16.msra.mxu1 %v2526_v41  ;;  %v275_v41 = vrot.slane %v257_v40, %v3208_v53 }
 0x14a   :  { %2336 = vmatprep.subr.bf16.mxu1 %v2902_v0 }
 0x1bd   :  { %v493_v42 = vpop.f32.mrb[0].mxu1 }
 0x1be   :  { %v2254_v43 = vpop.f32.mrb[1].mxu1  ;;  %v494_v20 = vadd.f32 %v493_v42, %v271_v17  ;;  %v1029_v42 = vrot.slane %v1024_v39, %v3208_v53 }
 0x1bf   :  { %v496_v44 = vpop.f32.mrb[2].mxu1  ;;  %v279_v43 = vrot.slane %v257_v40, %v3211_v56 }
 0x1c0   :  { %v2255_v45 = vpop.f32.mrb[3].mxu1  ;;  %v1033_v44 = vrot.slane %v1024_v39, %v3211_v56 }
 0x1c1   :  { %v2360_v45 = vadd.f32 %v1029_v42, %v275_v41  ;;  %v3255_v42 = vld [vmem:[#allocation7 + $0x10] sm:$0xff]  }
 0x1df   :  { %v3202_v46 = vpop.f32.mrb[4].mxu1 }
 0x1e0   :  { %v2274_v47 = vpop.f32.mrb[5].mxu1 }
 0x1e1   :  { %v705_v48 = vpop.f32.mrb[6].mxu1 }
 0x1e2   :  { %v2275_v50 = vpop.f32.mrb[7].mxu1 }
 0x1e3   :  { %v2362_v50 = vadd.f32 %v1033_v44, %v279_v43 }
 0x1fd   :  { %v921_v62 = vpop.f32.mrb[0].mxu0 }
 0x1fe   :  { %v2357_v2 = vadd.f32 %v2356_v61, %v921_v62  ;;  %v923_v3 = vpop.f32.mrb[1].mxu0 }
 0x1ff   :  { %v925_v4 = vpop.f32.mrb[2].mxu0  ;;  %v2359_v7 = vadd.f32 %v2358_v63, %v923_v3  ;;  %v962_v9 = vpop.f32.mrb[8].mxu1 }
 0x200   :  { %v2118_v5 = vmul.f32 -1.442695, %v2357_v2  ;;  %v926_v6 = vpop.f32.mrb[3].mxu0  ;;  %v2294_v10 = vpop.f32.mrb[9].mxu1  ;;  %v963_v21 = vadd.f32 %v962_v9, %v755_v18 }
 0x201   :  { %v2119_v8 = vmul.f32 -1.442695, %v2359_v7  ;;  %v965_v11 = vpop.f32.mrb[10].mxu1  ;;  %v283_v6 = vrot.slane %v257_v40, %v3218_v15  ;;  %v1037_v7 = vrot.slane %v1024_v39, %v3218_v15 }
 0x202   :  { %2543 = vpow2.f32 %v2118_v5  ;;  %v2295_v12 = vpop.f32.mrb[11].mxu1 }
 0x203   :  { %2545 = vpow2.f32 %v2119_v8  ;;  %v703_v9 = vadd.f32 %v3202_v46, %v283_v6 }
 0x20c   :  { %v2544_v13 = vpop.eup %2543 }
 0x20d   :  { %v972_v14 = vadd.f32 1.0, %v2544_v13  ;;  %v2546_v16 = vpop.eup %2545 }
 0x20e   :  { %v979_v19 = vadd.f32 1.0, %v2546_v16 }
 0x20f   :  { %2547 = vrcp.f32 %v972_v14  ;;  %v2905_v14 = vmov 1966171168  }
 0x210   :  { %2549 = vrcp.f32 %v979_v19  ;;  %v1292_v16 = vunpack.c.l.s4 %v2905_v14 }
 0x212   :  { %v1293_v18 = vunpack.c.0.s8 %v1292_v16 }
 0x219   :  { %v2548_v22 = vpop.eup %2547 }
 0x21a   :  { %v982_v1 = vmul.f32 %v2548_v22, %v494_v20  ;;  %v2550_v25 = vpop.eup %2549 }
 0x21b   :  { %v985_v26 = vsub.f32 1.0, %v2550_v25  ;;  %v987_v29 = vmul.f32 %v2550_v25, %v3156_v24  ;;  %v2529_v24 = vld [vmem:[#allocation16 + $0x10] sm:$0xff]  }
 0x21c   :  { %v983_v23 = vadd.f32 %v982_v1, %v963_v21  ;;  %v1296_v1 = vsub.s32 %v1293_v18, %v3205_v52  ;;  %v3243_v25 = vld [vmem:[#allocation7] sm:$0xff]  }
 0x21e   :  { %2551 = vtanh.f32 %v983_v23 }
 0x228   :  { %v2552_v27 = vpop.eup %2551 }
 0x229   :  { %v986_v28 = vmul.f32 %v2552_v27, %v985_v26 }
 0x22b   :  { %v988_v30 = vadd.f32 %v987_v29, %v986_v28  ;;  %v3245_v28 = vld [vmem:[#allocation7 + $0x8] sm:$0xff]   ;;  %v2165_v29 = vunpack.c.l.bf16 %v3243_v25 }
 0x22c   :  { %v2170_v44 = vunpack.c.h.bf16 %v3245_v28 }
 0x22d   :  { %v1022_v31 = vpack.c.bf16 %v988_v30, %v988_v30  ;;  %989 = vst [vmem:[#allocation21] sm:$0xff] %v988_v30 }
 0x22f   :  { %1202 = vmatmul.mubr.bf16.vlgmr.msra.gmra.mrb[4].mxu0 %v1022_v31  ;;  %2313 = vmatmul.mubr.bf16.vlgmr.msra.gmra.mrb[12].mxu1 %v1022_v31 }
 0x230   :  { %2352 = vmatprep.mubr.msk.bf16.mxu1 %vm2904_vm0, %v2902_v0  ;;  %2332 = vmatprep.mubr.msk.bf16.mxu0 %vm2904_vm0, %v2902_v0 }
 0x231   :  { %2337 = vmatpush3.bf16.msra.mxu1 %v2527_v32 }
 0x232   :  { %2338 = vmatprep.subr.bf16.mxu1 %v2902_v0 }
 0x235   :  { %2339 = vmatpush3.bf16.msra.mxu1 %v2528_v33  ;;  %v2169_v33 = vunpack.c.l.bf16 %v3245_v28 }
 0x236   :  { %2340 = vmatprep.subr.bf16.mxu1 %v2902_v0 }
 0x239   :  { %2341 = vmatpush3.bf16.msra.mxu1 %v2529_v24 }
 0x23a   :  { %2342 = vmatprep.subr.bf16.mxu1 %v2902_v0 }
 0x23d   :  { %2343 = vmatpush3.bf16.msra.mxu1 %v2530_v34 }
 0x23e   :  { %2344 = vmatprep.subr.bf16.mxu1 %v2902_v0 }
 0x241   :  { %2345 = vmatpush3.bf16.msra.mxu1 %v2531_v35  ;;  %v2166_v35 = vunpack.c.h.bf16 %v3243_v25 }
 0x242   :  { %2346 = vmatprep.subr.bf16.mxu1 %v2902_v0 }
 0x245   :  { %2347 = vmatpush3.bf16.msra.mxu1 %v2532_v36 }
 0x246   :  { %2348 = vmatprep.subr.bf16.mxu1 %v2902_v0 }
 0x249   :  { %2349 = vmatpush3.bf16.msra.mxu1 %v2533_v37 }
 0x24a   :  { %2350 = vmatprep.subr.bf16.mxu1 %v2902_v0 }
 0x24d   :  { %2351 = vmatpush3.bf16.msra.mxu1 %v2534_v38 }
 0x302   :  { %v1203_v47 = vpop.f32.mrb[4].mxu0  ;;  %v1244_v48 = vpop.f32.mrb[12].mxu1 }
 0x303   :  { %v2361_v54 = vadd.f32 %v2360_v45, %v1203_v47  ;;  %v1205_v55 = vpop.f32.mrb[5].mxu0  ;;  %v2314_v57 = vpop.f32.mrb[13].mxu1  ;;  %v1245_v11 = vadd.f32 %v1244_v48, %v1037_v7 }
 0x304   :  { %v1207_v58 = vpop.f32.mrb[6].mxu0  ;;  %v1247_v59 = vpop.f32.mrb[14].mxu1  ;;  %v2363_v63 = vadd.f32 %v2362_v50, %v1205_v55  ;;  %v2173_v50 = vunpack.c.l.bf16 %v3255_v42  ;;  %v3265_v57 = vld [vmem:[#allocation7 + $0x18] sm:$0xff]  }
 0x305   :  { %v2144_v60 = vmul.f32 -1.442695, %v2361_v54  ;;  %v1208_v61 = vpop.f32.mrb[7].mxu0  ;;  %v2315_v62 = vpop.f32.mrb[15].mxu1  ;;  %v2174_v59 = vunpack.c.h.bf16 %v3255_v42 }
 0x306   :  { %v2145_v2 = vmul.f32 -1.442695, %v2363_v63  ;;  %v2177_v63 = vunpack.c.l.bf16 %v3265_v57 }
 0x307   :  { %2553 = vpow2.f32 %v2144_v60 }
 0x308   :  { %2555 = vpow2.f32 %v2145_v2 }
 0x311   :  { %v2554_v3 = vpop.eup %2553 }
 0x312   :  { %v1254_v4 = vadd.f32 1.0, %v2554_v3  ;;  %v2556_v5 = vpop.eup %2555 }
 0x313   :  { %v1261_v8 = vadd.f32 1.0, %v2556_v5 }
 0x314   :  { %2557 = vrcp.f32 %v1254_v4  ;;  %v2178_v4 = vunpack.c.h.bf16 %v3265_v57 }
 0x315   :  { %2559 = vrcp.f32 %v1261_v8  ;;  %v1420_v8 = vand.u32 127, %v260_v51 }
 0x31e   :  { %v2558_v10 = vpop.eup %2557 }
 0x31f   :  { %v1264_v12 = vmul.f32 %v2558_v10, %v703_v9  ;;  %v2560_v17 = vpop.eup %2559 }
 0x320   :  { %v1267_v19 = vsub.f32 1.0, %v2560_v17  ;;  %v1269_v21 = vmul.f32 %v2560_v17, %v3170_v49 }
 0x321   :  { %v1265_v13 = vadd.f32 %v1264_v12, %v1245_v11  ;;  %v3285_v11 = vsub.s32 %v1420_v8, %v3205_v52 }
 0x323   :  { %2561 = vtanh.f32 %v1265_v13 }
 0x32d   :  { %v2562_v20 = vpop.eup %2561 }
 0x32e   :  { %v1268_v22 = vmul.f32 %v2562_v20, %v1267_v19 }
 0x330   :  { %v1270_v23 = vadd.f32 %v1269_v21, %v1268_v22 }
 0x332   :  { %v1758_v46 = vpack.c.bf16 %v1270_v23, %v1270_v23  ;;  %1272 = vst [vmem:[#allocation21 + $0x8] sm:$0xff] %v1270_v23  ;;  %v1297_v26 = vrot.slane %v1270_v23, %v1296_v1  ;;  %v1290_v27 = vcombine.high %v1270_v23, %v1270_v23 }
 0x334   :  { %2353 = vmatmul.mubr.bf16.vlgmr.msra.gmra.mrb[16].mxu1 %v1758_v46  ;;  %v1313_v30 = vrot.slane %v1297_v26, %v1296_v1  ;;  %v1305_v31 = vcombine.high %v1297_v26, %v1297_v26  ;;  %v1304_v32 = vrot.slane %v1290_v27, %v1296_v1 }
 0x336   :  { %v1342_v49 = vrot.slane %v1313_v30, %v3208_v53  ;;  %v1335_v24 = vcombine.high %v1313_v30, %v1313_v30  ;;  %v1327_v34 = vrot.slane %v1305_v31, %v1296_v1  ;;  %v1320_v36 = vrot.slane %v1304_v32, %v1296_v1 }
 0x337   :  { %v1306_v37 = vcombine.high %v1304_v32, %v1304_v32 }
 0x338   :  { %v1379_v38 = vmul.f32 %v2165_v29, %v1342_v49  ;;  %v1350_v39 = vrot.slane %v1335_v24, %v3208_v53  ;;  %v1346_v40 = vrot.slane %v1327_v34, %v3208_v53  ;;  %v1337_v41 = vcombine.high %v1327_v34, %v1327_v34 }
 0x339   :  { %v1334_v47 = vrot.slane %v1306_v37, %v1296_v1  ;;  %v1358_v54 = vrot.slane %v1320_v36, %v3208_v53  ;;  %v1336_v55 = vcombine.high %v1320_v36, %v1320_v36 }
 0x33a   :  { %1387 = vadd.xlane.f32.xlu0 %v1379_v38  ;;  %v1381_v43 = vmul.f32 %v2169_v33, %v1350_v39  ;;  %v1354_v45 = vrot.slane %v1337_v41, %v3208_v53  ;;  %v1380_v48 = vmul.f32 %v2166_v35, %v1346_v40 }
 0x33b   :  { %v1362_v60 = vrot.slane %v1334_v47, %v3208_v53  ;;  %v1338_v61 = vcombine.high %v1334_v47, %v1334_v47  ;;  %v1383_v62 = vmul.f32 %v2173_v50, %v1358_v54  ;;  %v1366_v2 = vrot.slane %v1336_v55, %v3208_v53 }
 0x33c   :  { %1391 = vadd.xlane.f32.xlu1 %v1381_v43  ;;  %v1382_v58 = vmul.f32 %v2170_v44, %v1354_v45 }
 0x33d   :  { %v1384_v3 = vmul.f32 %v2174_v59, %v1362_v60  ;;  %v1370_v5 = vrot.slane %v1338_v61, %v3208_v53  ;;  %v1385_v6 = vmul.f32 %v2177_v63, %v1366_v2 }
 0x33e   :  { %1389 = vadd.xlane.f32.xlu0 %v1380_v48 }
 0x33f   :  { %v1386_v7 = vmul.f32 %v2178_v4, %v1370_v5 }
 0x340   :  { %1393 = vadd.xlane.f32.xlu1 %v1382_v58  ;;  %v1487_v58 = vsub.s32 3, %v3205_v52 }
 0x342   :  { %1395 = vadd.xlane.f32.xlu0 %v1383_v62 }
 0x344   :  { %1397 = vadd.xlane.f32.xlu1 %v1384_v3  ;;  %v1491_v3 = vsub.s32 4, %v3205_v52 }
 0x346   :  { %1399 = vadd.xlane.f32.xlu0 %v1385_v6 }
 0x348   :  { %1401 = vadd.xlane.f32.xlu1 %v1386_v7 }
 0x3c7   :  { %v1388_v9 = vpop.xlane.xlu0 %1387 }
 0x3c8   :  { %v1403_v12 = vmul.f32 0.17677669, %v1388_v9 }
 0x3c9   :  { %v1392_v10 = vpop.xlane.xlu1 %1391 }
 0x3ca   :  { %v1405_v13 = vmul.f32 0.17677669, %v1392_v10  ;;  %v1424_v18 = vrot.slane %v1403_v12, %v3285_v11 }
 0x3cb   :  { %v1390_v14 = vpop.xlane.xlu0 %1389 }
 0x3cc   :  { %v1404_v16 = vmul.f32 0.17677669, %v1390_v14  ;;  %v1432_v21 = vrot.slane %v1405_v13, %v3285_v11  ;;  %v1495_v14 = vsub.s32 5, %v3205_v52 }
 0x3cd   :  { %v1394_v17 = vpop.xlane.xlu1 %1393 }
 0x3ce   :  { %v1428_v19 = vrot.slane %v1404_v16, %v3285_v11  ;;  %v1406_v20 = vmul.f32 0.17677669, %v1394_v17 }
 0x3cf   :  { %v1396_v51 = vpop.xlane.xlu0 %1395 }
 0x3d0   :  { %v1454_v22 = vsel %vm1453_vm1, %v1428_v19, %v1424_v18  ;;  %v1436_v1 = vrot.slane %v1406_v20, %v3285_v11  ;;  %v1407_v23 = vmul.f32 0.17677669, %v1396_v51 }
 0x3d1   :  { %v1456_v46 = vsel %vm1455_vm2, %v1432_v21, %v1454_v22  ;;  %v1398_v26 = vpop.xlane.xlu1 %1397  ;;  %v1499_v21 = vsub.s32 6, %v3205_v52 }
 0x3d2   :  { %v1458_v27 = vsel %vm1457_vm3, %v1436_v1, %v1456_v46  ;;  %v1440_v30 = vrot.slane %v1407_v23, %v3285_v11  ;;  %v1408_v31 = vmul.f32 0.17677669, %v1398_v26 }
 0x3d3   :  { %v1400_v32 = vpop.xlane.xlu0 %1399 }
 0x3d4   :  { %v1460_v49 = vsel %vm1459_vm4, %v1440_v30, %v1458_v27  ;;  %v1444_v24 = vrot.slane %v1408_v31, %v3285_v11  ;;  %v1409_v34 = vmul.f32 0.17677669, %v1400_v32 }
 0x3d5   :  { %v1402_v36 = vpop.xlane.xlu1 %1401 }
 0x3d6   :  { %v1448_v37 = vrot.slane %v1409_v34, %v3285_v11  ;;  %v1410_v38 = vmul.f32 0.17677669, %v1402_v36  ;;  %v1462_v39 = vsel %vm1461_vm5, %v1444_v24, %v1460_v49 }
 0x3d8   :  { %v1452_v40 = vrot.slane %v1410_v38, %v3285_v11  ;;  %v1464_v41 = vsel %vm1463_vm6, %v1448_v37, %v1462_v39 }
 0x3da   :  { %v1466_v43 = vsel %vm1465_vm7, %v1452_v40, %v1464_v41 }
 0x3db   :  { %v1469_v45 = vsel %vm1468_vm8, %v1466_v43, -inf }
 0x3dc   :  { %1470 = vmax.xlane.f32.xlu0 %v1469_v45 }
 0x407   :  { %v3303_v47 = vpop.f32.mrb[16].mxu1 }
 0x408   :  { %v2354_v48 = vpop.f32.mrb[17].mxu1 }
 0x409   :  { %v1997_v54 = vpop.f32.mrb[18].mxu1 }
 0x40a   :  { %v2355_v55 = vpop.f32.mrb[19].mxu1 }
 0x469   :  { %v1471_v60 = vpop.xlane.xlu0 %1470 }
 0x46a   :  { %v1476_v61 = vrot.slane %v1471_v60, %v3208_v53  ;;  %v1480_v62 = vrot.slane %v1471_v60, %v3211_v56  ;;  %v1484_v2 = vrot.slane %v1471_v60, %v3218_v15  ;;  %v1488_v5 = vrot.slane %v1471_v60, %v1487_v58 }
 0x46b   :  { %v1492_v17 = vrot.slane %v1471_v60, %v1491_v3  ;;  %v1496_v51 = vrot.slane %v1471_v60, %v1495_v14 }
 0x46c   :  { %v1513_v6 = vsub.f32 %v1403_v12, %v1476_v61  ;;  %v1514_v7 = vsub.f32 %v1404_v16, %v1480_v62  ;;  %v1515_v8 = vsub.f32 %v1405_v13, %v1484_v2  ;;  %v1516_v18 = vsub.f32 %v1406_v20, %v1488_v5 }
 0x46d   :  { %v1517_v22 = vsub.f32 %v1407_v23, %v1492_v17  ;;  %v1503_v13 = vsub.s32 7, %v3205_v52  ;;  %v1500_v16 = vrot.slane %v1471_v60, %v1499_v21  ;;  %v1518_v1 = vsub.f32 %v1408_v31, %v1496_v51  ;;  %v2539_v52 = vld [vmem:[#allocation17 + $0x20] sm:$0xff]  }
 0x46e   :  { %v1521_v9 = vmul.f32 1.442695, %v1513_v6  ;;  %v1523_v10 = vmul.f32 1.442695, %v1514_v7  ;;  %v1525_v19 = vmul.f32 1.442695, %v1515_v8 }
 0x46f   :  { %v1527_v12 = vmul.f32 1.442695, %v1516_v18  ;;  %v1529_v46 = vmul.f32 1.442695, %v1517_v22  ;;  %v1504_v27 = vrot.slane %v1471_v60, %v1503_v13  ;;  %v1519_v30 = vsub.f32 %v1409_v34, %v1500_v16 }
 0x470   :  { %2563 = vpow2.f32 %v1521_v9  ;;  %v1531_v32 = vmul.f32 1.442695, %v1518_v1 }
 0x471   :  { %2565 = vpow2.f32 %v1523_v10  ;;  %v1520_v49 = vsub.f32 %v1410_v38, %v1504_v27  ;;  %v1533_v24 = vmul.f32 1.442695, %v1519_v30 }
 0x472   :  { %2567 = vpow2.f32 %v1525_v19 }
 0x473   :  { %2569 = vpow2.f32 %v1527_v12  ;;  %v1535_v31 = vmul.f32 1.442695, %v1520_v49 }
 0x474   :  { %2571 = vpow2.f32 %v1529_v46 }
 0x475   :  { %2573 = vpow2.f32 %v1531_v32 }
 0x476   :  { %2575 = vpow2.f32 %v1533_v24 }
 0x477   :  { %2577 = vpow2.f32 %v1535_v31 }
 0x47a   :  { %v2564_v20 = vpop.eup %2563 }
 0x47b   :  { %v2566_v26 = vpop.eup %2565  ;;  %1546 = vperm.xlu1 %2397, %v2564_v20  }
 0x47c   :  { %1549 = vperm.xlu0 %2398, %v2566_v26   ;;  %v2568_v23 = vpop.eup %2567 }
 0x47d   :  { %v2570_v36 = vpop.eup %2569 }
 0x47e   :  { %v2572_v37 = vpop.eup %2571 }
 0x47f   :  { %1552 = vperm.xlu1 %2397, %v2568_v23   ;;  %v2574_v39 = vpop.eup %2573 }
 0x480   :  { %v2576_v40 = vpop.eup %2575 }
 0x481   :  { %v2578_v34 = vpop.eup %2577 }
 0x483   :  { %1555 = vperm.xlu1 %2397, %v2570_v36  }
 0x487   :  { %1558 = vperm.xlu1 %2397, %v2572_v37  }
 0x48b   :  { %1561 = vperm.xlu1 %2397, %v2574_v39  }
 0x48f   :  { %1564 = vperm.xlu1 %2397, %v2576_v40  }
 0x493   :  { %1567 = vperm.xlu1 %2397, %v2578_v34  }
 0x4fa   :  { %v1547_v41 = vpop.permute.xlu1 %1546 }
 0x4fb   :  { %v1550_v38 = vpop.permute.xlu0 %1549  ;;  %v1572_v60 = vrot.slane %v1547_v41, %v3285_v11 }
 0x4fc   :  { %v1576_v55 = vrot.slane %v1550_v38, %v3285_v11 }
 0x4fe   :  { %v1553_v43 = vpop.permute.xlu1 %1552  ;;  %v1601_v6 = vsel %vm1453_vm1, %v1576_v55, %v1572_v60 }
 0x4ff   :  { %v1580_v61 = vrot.slane %v1553_v43, %v3285_v11 }
 0x501   :  { %v1602_v8 = vsel %vm1455_vm2, %v1580_v61, %v1601_v6 }
 0x502   :  { %v1556_v45 = vpop.permute.xlu1 %1555 }
 0x503   :  { %v1584_v62 = vrot.slane %v1556_v45, %v3285_v11 }
 0x505   :  { %v1603_v10 = vsel %vm1457_vm3, %v1584_v62, %v1602_v8 }
 0x506   :  { %v1559_v48 = vpop.permute.xlu1 %1558 }
 0x507   :  { %v1588_v2 = vrot.slane %v1559_v48, %v3285_v11 }
 0x509   :  { %v1604_v17 = vsel %vm1459_vm4, %v1588_v2, %v1603_v10 }
 0x50a   :  { %v1562_v54 = vpop.permute.xlu1 %1561 }
 0x50b   :  { %v1592_v7 = vrot.slane %v1562_v54, %v3285_v11 }
 0x50d   :  { %v1605_v19 = vsel %vm1461_vm5, %v1592_v7, %v1604_v17 }
 0x50e   :  { %v1565_v5 = vpop.permute.xlu1 %1564 }
 0x50f   :  { %v1596_v9 = vrot.slane %v1565_v5, %v3285_v11 }
 0x511   :  { %v1606_v22 = vsel %vm1463_vm6, %v1596_v9, %v1605_v19 }
 0x512   :  { %v1568_v18 = vpop.permute.xlu1 %1567 }
 0x513   :  { %v1600_v51 = vrot.slane %v1568_v18, %v3285_v11 }
 0x515   :  { %v1607_v12 = vsel %vm1465_vm7, %v1600_v51, %v1606_v22 }
 0x516   :  { %v1609_v16 = vsel %vm1468_vm8, %v1607_v12, 0.0 }
 0x517   :  { %1610 = vadd.xlane.f32.xlu1 %v1609_v16 }
 0x5a4   :  { %v1611_v1 = vpop.xlane.xlu1 %1610 }
 0x5a5   :  { %2579 = vrcp.f32 %v1611_v1 }
 0x5af   :  { %v2580_v46 = vpop.eup %2579 }
 0x5b0   :  { %v1617_v27 = vrot.slane %v2580_v46, %v3208_v53  ;;  %v1621_v32 = vrot.slane %v2580_v46, %v3211_v56  ;;  %v1625_v24 = vrot.slane %v2580_v46, %v3218_v15  ;;  %v1629_v31 = vrot.slane %v2580_v46, %v1487_v58 }
 0x5b1   :  { %v1633_v43 = vrot.slane %v2580_v46, %v1491_v3  ;;  %v1637_v53 = vrot.slane %v2580_v46, %v1495_v14  ;;  %v1641_v15 = vrot.slane %v2580_v46, %v1499_v21  ;;  %v1645_v58 = vrot.slane %v2580_v46, %v1503_v13  ;;  %v2536_v3 = vld [vmem:[#allocation17 + $0x8] sm:$0xff]   ;;  %v2537_v14 = vld [vmem:[#allocation17 + $0x10] sm:$0xff]   ;;  %v2538_v21 = vld [vmem:[#allocation17 + $0x18] sm:$0xff]  }
 0x5b2   :  { %v1654_v30 = vmul.f32 %v2564_v20, %v1617_v27  ;;  %v1655_v49 = vmul.f32 %v2566_v26, %v1621_v32  ;;  %v1656_v11 = vmul.f32 %v2568_v23, %v1625_v24  ;;  %v1657_v41 = vmul.f32 %v2570_v36, %v1629_v31  ;;  %v2535_v26 = vld [vmem:[#allocation17] sm:$0xff]   ;;  %v2540_v13 = vld [vmem:[#allocation17 + $0x28] sm:$0xff]   ;;  %v2541_v36 = vld [vmem:[#allocation17 + $0x30] sm:$0xff]  }
 0x5b3   :  { %v1658_v45 = vmul.f32 %v2572_v37, %v1633_v43  ;;  %v1659_v56 = vmul.f32 %v2574_v39, %v1637_v53  ;;  %v1660_v20 = vmul.f32 %v2576_v40, %v1641_v15  ;;  %2317 = vmatpush3.bf16.msra.mxu0 %v2535_v26  ;;  %v1661_v23 = vmul.f32 %v2578_v34, %v1645_v58  ;;  %v2542_v37 = vld [vmem:[#allocation17 + $0x38] sm:$0xff]  }
 0x5b4   :  { %1664 = vperm.xlu0 %2398, %v1654_v30   ;;  %2318 = vmatprep.subr.bf16.mxu0 %v2902_v0 }
 0x5b7   :  { %2319 = vmatpush3.bf16.msra.mxu0 %v2536_v3 }
 0x5b8   :  { %1669 = vperm.xlu0 %2398, %v1655_v49   ;;  %2320 = vmatprep.subr.bf16.mxu0 %v2902_v0 }
 0x5bb   :  { %2321 = vmatpush3.bf16.msra.mxu0 %v2537_v14 }
 0x5bc   :  { %1674 = vperm.xlu0 %2398, %v1656_v11   ;;  %2322 = vmatprep.subr.bf16.mxu0 %v2902_v0 }
 0x5bf   :  { %2323 = vmatpush3.bf16.msra.mxu0 %v2538_v21 }
 0x5c0   :  { %1679 = vperm.xlu0 %2398, %v1657_v41   ;;  %2324 = vmatprep.subr.bf16.mxu0 %v2902_v0 }
 0x5c3   :  { %2325 = vmatpush3.bf16.msra.mxu0 %v2539_v52 }
 0x5c4   :  { %1684 = vperm.xlu0 %2398, %v1658_v45   ;;  %2326 = vmatprep.subr.bf16.mxu0 %v2902_v0 }
 0x5c7   :  { %2327 = vmatpush3.bf16.msra.mxu0 %v2540_v13 }
 0x5c8   :  { %1689 = vperm.xlu0 %2398, %v1659_v56   ;;  %2328 = vmatprep.subr.bf16.mxu0 %v2902_v0 }
 0x5cb   :  { %2329 = vmatpush3.bf16.msra.mxu0 %v2541_v36 }
 0x5cc   :  { %1694 = vperm.xlu0 %2398, %v1660_v20   ;;  %2330 = vmatprep.subr.bf16.mxu0 %v2902_v0 }
 0x5cf   :  { %2331 = vmatpush3.bf16.msra.mxu0 %v2542_v37 }
 0x5d0   :  { %1699 = vperm.xlu0 %2398, %v1661_v23  }
 0x633   :  { %v1665_v39 = vpop.permute.xlu0 %1664 }
 0x634   :  { %v1702_v48 = vmul.f32 %v2165_v29, %v1665_v39 }
 0x636   :  { %v1710_v60 = vrot.slane %v1702_v48, 4 }
 0x637   :  { %v1670_v40 = vpop.permute.xlu0 %1669 }
 0x638   :  { %v1703_v34 = vmul.f32 %v2166_v35, %v1670_v40  ;;  %v1711_v5 = vadd.f32 %v1710_v60, %v1702_v48 }
 0x63a   :  { %v1716_v54 = vrot.slane %v1703_v34, 4  ;;  %v1712_v25 = vrot.slane %v1711_v5, 2 }
 0x63b   :  { %v1675_v38 = vpop.permute.xlu0 %1674 }
 0x63c   :  { %v1704_v55 = vmul.f32 %v2169_v33, %v1675_v38  ;;  %v1717_v2 = vadd.f32 %v1716_v54, %v1703_v34  ;;  %v1713_v28 = vadd.f32 %v1712_v25, %v1711_v5 }
 0x63e   :  { %v1722_v61 = vrot.slane %v1704_v55, 4  ;;  %v1718_v35 = vrot.slane %v1717_v2, 2 }
 0x63f   :  { %v1680_v62 = vpop.permute.xlu0 %1679 }
 0x640   :  { %v1705_v0 = vmul.f32 %v2170_v44, %v1680_v62  ;;  %v1723_v6 = vadd.f32 %v1722_v61, %v1704_v55  ;;  %v1719_v19 = vadd.f32 %v1718_v35, %v1717_v2 }
 0x642   :  { %v1728_v7 = vrot.slane %v1705_v0, 4  ;;  %v1724_v29 = vrot.slane %v1723_v6, 2  ;;  %v1720_v27 = vrot.slane %v1719_v19, 1 }
 0x643   :  { %v1685_v8 = vpop.permute.xlu0 %1684 }
 0x644   :  { %v1729_v9 = vadd.f32 %v1728_v7, %v1705_v0  ;;  %v1706_v10 = vmul.f32 %v2173_v50, %v1685_v8  ;;  %v1725_v44 = vadd.f32 %v1724_v29, %v1723_v6  ;;  %v1714_v50 = vrot.slane %v1713_v28, 1 }
 0x645   :  { %v1721_v43 = vadd.f32 %v1720_v27, %v1719_v19 }
 0x646   :  { %v1730_v17 = vrot.slane %v1729_v9, 2  ;;  %v1734_v33 = vrot.slane %v1706_v10, 4  ;;  %v1726_v49 = vrot.slane %v1725_v44, 1  ;;  %v1715_v15 = vadd.f32 %v1714_v50, %v1713_v28 }
 0x647   :  { %v1690_v18 = vpop.permute.xlu0 %1689  ;;  %v1776_v14 = vpack.c.bf16 %v1721_v43, %v1721_v43 }
 0x648   :  { %v1707_v51 = vmul.f32 %v2174_v59, %v1690_v18  ;;  %v1735_v22 = vadd.f32 %v1734_v33, %v1706_v10  ;;  %v1731_v12 = vadd.f32 %v1730_v17, %v1729_v9  ;;  %v1727_v20 = vadd.f32 %v1726_v49, %v1725_v44 }
 0x649   :  { %v1775_v37 = vpack.c.bf16 %v1715_v15, %v1715_v15  ;;  %v1808_v38 = vunpack.c.l.b16 %v1776_v14 }
 0x64a   :  { %v1740_v16 = vrot.slane %v1707_v51, 4  ;;  %v1736_v1 = vrot.slane %v1735_v22, 2  ;;  %v1732_v11 = vrot.slane %v1731_v12, 1  ;;  %v1777_v36 = vpack.c.bf16 %v1727_v20, %v1727_v20 }
 0x64b   :  { %v1695_v46 = vpop.permute.xlu0 %1694  ;;  %v1807_v60 = vunpack.c.l.b16 %v1775_v37 }
 0x64c   :  { %v1741_v30 = vadd.f32 %v1740_v16, %v1707_v51  ;;  %v1708_v32 = vmul.f32 %v2177_v63, %v1695_v46  ;;  %v1737_v24 = vadd.f32 %v1736_v1, %v1735_v22  ;;  %v1733_v58 = vadd.f32 %v1732_v11, %v1731_v12 }
 0x64d   :  { %v1809_v55 = vunpack.c.l.b16 %v1777_v36  ;;  %v1815_v5 = vsel %vm1453_vm1, %v1808_v38, %v1807_v60 }
 0x64e   :  { %v1742_v31 = vrot.slane %v1741_v30, 2  ;;  %v1746_v41 = vrot.slane %v1708_v32, 4  ;;  %v1738_v42 = vrot.slane %v1737_v24, 1  ;;  %v1778_v39 = vpack.c.bf16 %v1733_v58, %v1733_v58 }
 0x64f   :  { %v1700_v59 = vpop.permute.xlu0 %1699  ;;  %v1816_v8 = vsel %vm1455_vm2, %v1809_v55, %v1815_v5 }
 0x650   :  { %v1743_v45 = vadd.f32 %v1742_v31, %v1741_v30  ;;  %v1747_v53 = vadd.f32 %v1746_v41, %v1708_v32  ;;  %v1709_v56 = vmul.f32 %v2178_v4, %v1700_v59  ;;  %v1739_v3 = vadd.f32 %v1738_v42, %v1737_v24 }
 0x651   :  { %v1810_v61 = vunpack.c.l.b16 %v1778_v39 }
 0x652   :  { %v1744_v26 = vrot.slane %v1743_v45, 1  ;;  %v1748_v23 = vrot.slane %v1747_v53, 2  ;;  %v1752_v63 = vrot.slane %v1709_v56, 4  ;;  %v1779_v48 = vpack.c.bf16 %v1739_v3, %v1739_v3 }
 0x653   :  { %v1817_v9 = vsel %vm1457_vm3, %v1810_v61, %v1816_v8 }
 0x654   :  { %v1745_v21 = vadd.f32 %v1744_v26, %v1743_v45  ;;  %v1749_v52 = vadd.f32 %v1748_v23, %v1747_v53  ;;  %v1753_v13 = vadd.f32 %v1752_v63, %v1709_v56  ;;  %v1811_v0 = vunpack.c.l.b16 %v1779_v48 }
 0x656   :  { %v1750_v40 = vrot.slane %v1749_v52, 1  ;;  %v1754_v34 = vrot.slane %v1753_v13, 2  ;;  %v1780_v57 = vpack.c.bf16 %v1745_v21, %v1745_v21  ;;  %v1818_v29 = vsel %vm1459_vm4, %v1811_v0, %v1817_v9 }
 0x658   :  { %v1751_v4 = vadd.f32 %v1750_v40, %v1749_v52  ;;  %v1755_v54 = vadd.f32 %v1754_v34, %v1753_v13  ;;  %v1812_v6 = vunpack.c.l.b16 %v1780_v57 }
 0x65a   :  { %v1781_v62 = vpack.c.bf16 %v1751_v4, %v1751_v4  ;;  %v1756_v2 = vrot.slane %v1755_v54, 1  ;;  %v1819_v10 = vsel %vm1461_vm5, %v1812_v6, %v1818_v29 }
 0x65c   :  { %v1757_v7 = vadd.f32 %v1756_v2, %v1755_v54  ;;  %v1813_v35 = vunpack.c.l.b16 %v1781_v62 }
 0x65e   :  { %v1782_v25 = vpack.c.bf16 %v1757_v7, %v1757_v7  ;;  %v1820_v33 = vsel %vm1463_vm6, %v1813_v35, %v1819_v10 }
 0x660   :  { %v1814_v17 = vunpack.c.l.b16 %v1782_v25 }
 0x662   :  { %v1821_v18 = vsel %vm1465_vm7, %v1814_v17, %v1820_v33 }
 0x663   :  { %v1822_v19 = vpack.c.b16 %v1821_v18, %v1821_v18 }
 0x665   :  { %2333 = vmatmul.mubr.bf16.vlgmr.msra.gmra.mrb[8].mxu0 %v1822_v19 }
 0x666   :  { %2834 = shalt.err (!%p2831_p8)
}
 0x667   :  { %s2835_s18 = scalar_lea.hbm %s3422_s12, 256 }
 0x668   :  { %p2836_p9 = scmp.ne.s32.totalorder %s3422_s12, %s2835_s18  ;;  %p2839_p10 = scmp.lt.u32.totalorder %s2835_s18, %s3422_s12 }
 0x66a   :  { %p2841_p11 = pnand %p2839_p10, %p2836_p9 }
 0x66c   :  { %2844 = shalt.err (!%p2841_p11)
}
 0x66d   :  { %2031 = dma.vmem_to_hbm [thread:$0]  %s2026_s0, 256, %s3422_s12, [#allocation22], %s2884_s13, %s2884_s13, %s2885_s14   ;;  %v2162_v28 = vld [vmem:[#allocation19] ss:$0 sm:$0xff] }
 0x66e   :  { %s2907_s6 = smov [#allocation20]  }
 0x66f   :  { %s2016_s5 = sshll.u32 %s2907_s6, 4  ;;  %s2017_s5 = int_to_ptr.vmem [resolvable:$true] %s2016_s5 }
 0x670   :  { %s2845_s15 = scalar_lea.vmem %s2017_s5, 128  ;;  %p2850_p13 = scmp.lt.s32.totalorder %s2017_s5, %s2017_s5 }
 0x671   :  { %p2846_p12 = scmp.ne.s32.totalorder %s2017_s5, %s2845_s15  ;;  %p2851_p0 = scmp.lt.s32.totalorder %s2845_s15, %s2845_s15 }
 0x673   :  { %p2852_p1 = por %p2851_p0, %p2850_p13 }
 0x675   :  { %p2853_p2 = pnand %p2852_p1, %p2846_p12 }
 0x738   :  { %v1906_v51 = vpop.f32.mrb[8].mxu0 }
 0x739   :  { %v1995_v44 = vadd.f32 %v3303_v47, %v1906_v51  ;;  %v2334_v22 = vpop.f32.mrb[9].mxu0 }
 0x73a   :  { %v1909_v12 = vpop.f32.mrb[10].mxu0 }
 0x73b   :  { %v2007_v16 = vadd.f32 %v2162_v28, %v1995_v44  ;;  %v2335_v1 = vpop.f32.mrb[11].mxu0 }
 0x73d   :  { %v2008_v46 = vmax.f32 %v2007_v16, 0.0 }
 0x73f   :  { %2009 = vst [vmem:[#allocation20] sm:$0xff] %v2008_v46 }
 0x740   :  { %2856 = shalt.err (!%p2853_p2)
}
 0x741   :  { %s2857_s14 = scalar_lea.hbm %s3421_s11, 128 }
 0x742   :  { %p2858_p3 = scmp.ne.s32.totalorder %s3421_s11, %s2857_s14  ;;  %p2861_p4 = scmp.lt.u32.totalorder %s2857_s14, %s3421_s11 }
 0x744   :  { %p2863_p5 = pnand %p2861_p4, %p2858_p3 }
 0x746   :  { %2866 = shalt.err (!%p2863_p5)
}
 0x747   :  { %2019 = dma.vmem_to_hbm [thread:$0]  %s2017_s5, 128, %s3421_s11, [#allocation4]  }
 0x748   :  { %2879 = dma.done.wait [#allocation4], 128  }
 0x749   :  { %2880 = vsyncadd [#allocation4], 4294967168 }
 0x74a   :  { %2881 = dma.done.wait [#allocation22], 256  }
 0x74b   :  { %2882 = vsyncadd [#allocation22], 4294967040 }
 0x74c   :  { %2038 = vsyncpa [#allocation3], 1 }
 0x74d   :  { %2039 = vsyncpa [#allocation6], 1 }
 0x74e   :  { %2040 = vsyncpa [#allocation9], 1 }
 0x74f   :  { %2041 = vsyncpa [#allocation12], 1 }
 0x750   :  { %2042 = vsyncpa [#allocation15], 1 }
 0x751   :  { %2043 = vsyncpa [#allocation18], 1 }
 0x752   :  { %2044 = vsyncpa [#allocation4], 1 }
 0x753   :  { %2045 = vsyncpa [#allocation22], 1 }

</bundles_post_ra>
